<compile_context>
chip_gen: v7x
topology: tpu7x:2x2x1
jax: 0.10.0
libtpu: 0.0.40
codegen_flags: <defaults>
</compile_context>

<pallas_src>
import functools
import math

import jax
import jax.numpy as jnp
import numpy as np
from jax import lax
from jax.experimental import pallas as pl
from jax.experimental.pallas import tpu as pltpu


# ----------------------------- kernels -------------------------------------


def _make_conv_stats_kernel(Nb, Wp, Lspan, K, D, Cout, store_dtype):
    """Folded projected conv (feature + mask paths), gate sigmoid, BN partial sums.

    Per-tap accumulation (no materialized im2col): each of the K*K filter taps
    feeds a lane-dense slice of the flattened padded image straight into the MXU;
    partial products accumulate in a (2*Cout, Lspan) f32 value.
    """

    def kernel(xp_ref, w_ref, b_ref, valid_ref, xo_ref, go_ref, sum_ref, ssq_ref):
        valid = valid_ref[...]                               # (1, Lspan) f32 {0,1}

        s_acc = jnp.zeros((Cout, 1), jnp.float32)            # BN partials for this
        q_acc = jnp.zeros((Cout, 1), jnp.float32)            # grid block only

        for nb in range(Nb):
            acc = None
            for kh in range(K):
                for kw in range(K):
                    off = kh * D * Wp + kw * D
                    part = jnp.dot(w_ref[kh * K + kw],               # (2*Cout, Cpad)
                                   xp_ref[nb, :, off:off + Lspan],   # (Cpad, Lspan)
                                   preferred_element_type=jnp.float32)
                    acc = part if acc is None else acc + part
            acc = acc + b_ref[...]                           # (2*Cout, Lspan) f32

            yx = acc[:Cout, :]                               # feature path
            ym = acc[Cout:, :]                               # mask path
            xo_ref[nb] = yx.astype(store_dtype)
            go_ref[nb] = jax.nn.sigmoid(ym).astype(store_dtype)   # gate (EUP slot)

            # BN statistics from the f32 accumulator (mask padded-width columns).
            vx = yx * valid
            s_acc = s_acc + jnp.sum(vx, axis=1, keepdims=True)
            q_acc = q_acc + jnp.sum(yx * vx, axis=1, keepdims=True)

        sum_ref[0] = s_acc                                   # per-block partial sums
        ssq_ref[0] = q_acc

    return kernel


def _make_gate_kernel(slope):
    """BatchNorm affine (precomputed scale/shift) + LeakyReLU * precomputed gate."""

    def kernel(x_ref, g_ref, scale_ref, shift_ref, o_ref):
        x = x_ref[...].astype(jnp.float32)                   # (Nb2, Cout, Lt)
        xn = x * scale_ref[...][None] + shift_ref[...][None]
        act = jnp.where(xn > 0, xn, slope * xn)              # LeakyReLU(0.2)
        o_ref[...] = (act * g_ref[...].astype(jnp.float32)).astype(o_ref.dtype)

    return kernel


# ----------------------------- wrapper helpers -------------------------------


def _tpu_vmem_capacity_bytes():
    try:
        cap = int(getattr(pltpu.get_tpu_info(), "vmem_capacity_bytes", 0) or 0)
        if cap > 0:
            return cap
    except Exception:
        pass
    return 64 * 1024 * 1024          # conservative (v7x-sized) fallback


def _pick_batch_block(n, per_image_bytes, budget_bytes, cap=8):
    nb = min(n, cap)
    while nb > 1 and (n % nb != 0 or nb * per_image_bytes > budget_bytes):
        nb -= 1
    return nb


def _fold_path(p, K, Cin, Cpad, compute_dtype):
    """Fold conv1(1x1) -> conv2(KxK) -> conv3(1x1) into one KxK conv (exact)."""
    w1, b1 = p["w1"], p["b1"]        # (Cin, Ci), (1, Ci)
    w2, b2 = p["w2"], p["b2"]        # (K, K, Ci_in, Ci_out) HWIO, (1, Ci)
    w3, b3 = p["w3"], p["b3"]        # (Ci, Cout), (1, Cout)
    Ci = w1.shape[1]
    Cout = w3.shape[1]

    # conv1 with its bias acts on the augmented input [x ; 1]:
    W1_aug = jnp.concatenate([w1.T, b1.reshape(Ci, 1)], axis=1)       # (Ci, Cin+1)
    # W_eff[kh,kw] = W3 @ W2[kh,kw] @ W1_aug  -> (K, K, Cout, Cin+1)
    W_eff = jnp.einsum("co,kldc,de->kloe", w3, w2, W1_aug)
    W_pad = jnp.zeros((K, K, Cout, Cpad), jnp.float32).at[..., :Cin + 1].set(W_eff)
    W_tap = W_pad.reshape(K * K, Cout, Cpad)                          # per-tap weights
    B_eff = b2[0] @ w3 + b3[0]                                        # (Cout,)
    return W_tap.astype(compute_dtype), B_eff


# ----------------------------- wrapper ---------------------------------------


def sn_gated_proj_conv2d(x_nchw, params, *, kernel_size, stride=1, padding=0,
                         dilation=1, eps=1e-5, negative_slope=0.2,
                         compute_dtype=jnp.bfloat16):
    N, Cin, H, W = x_nchw.shape
    K, S, P, D = kernel_size, stride, padding, dilation
    Cout = params["x"]["w3"].shape[1]
    Ho = (H + 2 * P - D * (K - 1) - 1) // S + 1
    Wo = (W + 2 * P - D * (K - 1) - 1) // S + 1
    Hp, Wp = H + 2 * P, W + 2 * P
    HpWp = Hp * Wp
    # lane span of one shifted window of the flattened padded image; valid output
    # columns sit at col = S*(ho*Wp + wo).
    Lspan = (Ho - 1) * S * Wp + (Wo - 1) * S + 1

    store_dtype = compute_dtype                  # pass-1 intermediate precision
    es = jnp.dtype(compute_dtype).itemsize
    sub = 16 if es == 2 else 8
    Cpad = -(-(Cin + 1) // sub) * sub            # ones channel + sublane padding

    # ---- per-generation VMEM budget -> block sizes ---------------------------
    vmem_cap = _tpu_vmem_capacity_bytes()
    vmem_limit = int(vmem_cap * 0.75)            # ~48 MiB v7x, ~96 MiB v5e/v6e
    blk_budget = int(vmem_limit * 0.6)           # headroom for compiler internals

    per_img1 = (2 * Cpad * HpWp * es             # input block, double-buffered
                + 2 * 2 * Cout * Lspan * es)     # two intermediate outputs, dbl-buf
    fixed1 = (2 * Cout * Lspan * 4               # f32 accumulator
              + 2 * K * K * 2 * Cout * Cpad * es + 2 * Lspan * 4)
    Nb = _pick_batch_block(N, per_img1, max(blk_budget - fixed1, 0))

    LANE_CHUNK = 8192                            # pass-2 lane tile (mult. of 128)
    Lt = Lspan if Lspan <= LANE_CHUNK else LANE_CHUNK
    n_lblk = pl.cdiv(Lspan, Lt)
    per_img2 = 2 * 3 * Cout * Lt * es            # x/g/out blocks, double-buffered
    Nb2 = _pick_batch_block(N, per_img2, blk_budget)

    # ---- wrapper-side layout plumbing (all XLA, in the compute dtype) --------
    x = x_nchw.astype(compute_dtype)
    ones = jnp.ones((N, 1, H, W), compute_dtype)
    x_aug = jnp.concatenate([x, ones], axis=1)                     # bias channel
    x_flat = jnp.pad(x_aug, ((0, 0), (0, Cpad - Cin - 1), (P, P), (P, P))
                     ).reshape(N, Cpad, HpWp)

    # ---- fold both conv chains; concatenate feature + mask paths -------------
    Wx, Bx = _fold_path(params["x"], K, Cin, Cpad, compute_dtype)
    Wm, Bm = _fold_path(params["m"], K, Cin, Cpad, compute_dtype)
    W_both = jnp.concatenate([Wx, Wm], axis=1)                     # (K*K, 2*Cout, Cpad)
    B_both = jnp.concatenate([Bx, Bm], axis=0).reshape(2 * Cout, 1).astype(jnp.float32)

    # validity mask of the lane-dense column layout (for the BN statistics)
    cols = np.arange(Lspan)
    valid_np = (cols % S == 0) & (((cols // S) % Wp) < Wo)
    valid = jnp.asarray(valid_np.reshape(1, Lspan), jnp.float32)

    NBlk = N // Nb
    feat_spec1 = pl.BlockSpec((Nb, Cout, Lspan), lambda b: (b, 0, 0))
    stat_spec = pl.BlockSpec((1, Cout, 1), lambda b: (b, 0, 0))

    # ---- pass 1: folded conv (both paths) + gate sigmoid + BN partial sums ---
    conv_kernel = _make_conv_stats_kernel(Nb, Wp, Lspan, K, D, Cout, store_dtype)
    x_raw, g_raw, s_parts, q_parts = pl.pallas_call(
        conv_kernel,
        out_shape=(jax.ShapeDtypeStruct((N, Cout, Lspan), store_dtype),
                   jax.ShapeDtypeStruct((N, Cout, Lspan), store_dtype),
                   jax.ShapeDtypeStruct((NBlk, Cout, 1), jnp.float32),
                   jax.ShapeDtypeStruct((NBlk, Cout, 1), jnp.float32)),
        grid=(NBlk,),
        in_specs=[pl.BlockSpec((Nb, Cpad, HpWp), lambda b: (b, 0, 0)),
                  pl.BlockSpec((K * K, 2 * Cout, Cpad), lambda b: (0, 0, 0)),
                  pl.BlockSpec((2 * Cout, 1), lambda b: (0, 0)),
                  pl.BlockSpec((1, Lspan), lambda b: (0, 0))],
        out_specs=(feat_spec1, feat_spec1, stat_spec, stat_spec),
        compiler_params=pltpu.CompilerParams(
            dimension_semantics=("parallel",),      # per-block partials -> shardable
            vmem_limit_bytes=vmem_limit),
    )(x_flat, W_both, B_both, valid)

    # ---- reduce BN partials, fold into an affine scale/shift (tiny, XLA) -----
    count = float(N * Ho * Wo)
    mean = jnp.sum(s_parts, axis=0) / count                     # (Cout, 1)
    var = jnp.sum(q_parts, axis=0) / count - mean * mean        # biased (training BN)
    gamma = params["gamma"].reshape(Cout, 1).astype(jnp.float32)
    beta = params["beta"].reshape(Cout, 1).astype(jnp.float32)
    scale = gamma * lax.rsqrt(var + eps)
    shift = beta - mean * scale

    # ---- pass 2: BN affine + LeakyReLU * gate (elementwise, lane-tiled) ------
    feat_spec2 = pl.BlockSpec((Nb2, Cout, Lt), lambda b, l: (b, 0, l))
    coef_spec = pl.BlockSpec((Cout, 1), lambda b, l: (0, 0))
    gate_kernel = _make_gate_kernel(negative_slope)
    y_flat = pl.pallas_call(
        gate_kernel,
        out_shape=jax.ShapeDtypeStruct((N, Cout, Lspan), store_dtype),
        grid=(N // Nb2, n_lblk),
        in_specs=[feat_spec2, feat_spec2, coef_spec, coef_spec],
        out_specs=feat_spec2,
        input_output_aliases={0: 0},                 # overwrite x_raw in place
        compiler_params=pltpu.CompilerParams(
            dimension_semantics=("parallel", "parallel"),
            vmem_limit_bytes=vmem_limit),
    )(x_raw, g_raw, scale, shift)

    # ---- compact the lane-dense padded-width layout back to NCHW -------------
    yq = y_flat[:, :, ::S]                           # columns q = ho*Wp + wo
    yq = jnp.pad(yq, ((0, 0), (0, 0), (0, Ho * Wp - yq.shape[-1])))
    y = yq.reshape(N, Cout, Ho, Wp)[:, :, :, :Wo]
    return y.astype(jnp.float32)


# ----------------------------- parameters -----------------------------------


def init_params(key, in_channels, out_channels, kernel_size, proj_ratio=4):
    inter = max(in_channels // proj_ratio, 1)

    def conv_weight(k, out_c, in_c, kh, kw):
        fan_in = in_c * kh * kw
        std = math.sqrt(2.0 / fan_in)                 # kaiming_normal_ (a=0)
        return std * jax.random.normal(k, (out_c, in_c, kh, kw), jnp.float32)

    def conv_bias(k, out_c, in_c, kh, kw):
        bound = 1.0 / math.sqrt(in_c * kh * kw)       # PyTorch Conv2d default
        return jax.random.uniform(k, (out_c,), jnp.float32, -bound, bound)

    def spectral_norm(w, k, n_iter=1, sn_eps=1e-12):
        # nn.utils.spectral_norm: one power iteration on the (out, -1) matrix.
        wm = w.reshape(w.shape[0], -1)
        u = jax.random.normal(k, (w.shape[0],), jnp.float32)
        u = u / (jnp.linalg.norm(u) + sn_eps)
        v = u
        for _ in range(n_iter):
            v = wm.T @ u
            v = v / (jnp.linalg.norm(v) + sn_eps)
            u = wm @ v
            u = u / (jnp.linalg.norm(u) + sn_eps)
        sigma = u @ (wm @ v)
        return w / sigma

    def path(ks):
        w1 = spectral_norm(conv_weight(ks[0], inter, in_channels, 1, 1), ks[1])
        b1 = conv_bias(ks[2], inter, in_channels, 1, 1)
        w2 = spectral_norm(conv_weight(ks[3], inter, inter,
                                       kernel_size, kernel_size), ks[4])
        b2 = conv_bias(ks[5], inter, inter, kernel_size, kernel_size)
        w3 = spectral_norm(conv_weight(ks[6], out_channels, inter, 1, 1), ks[7])
        b3 = conv_bias(ks[8], out_channels, inter, 1, 1)
        # PyTorch OIHW -> matmul / HWIO forms used by the wrapper + reference
        return {
            "w1": jnp.transpose(w1[:, :, 0, 0]),          # (Cin, Ci)
            "b1": b1.reshape(1, -1),
            "w2": jnp.transpose(w2, (2, 3, 1, 0)),        # (K, K, Ci_in, Ci_out)
            "b2": b2.reshape(1, -1),
            "w3": jnp.transpose(w3[:, :, 0, 0]),          # (Ci, Cout)
            "b3": b3.reshape(1, -1),
        }

    k_feat, k_mask = jax.random.split(key)
    return {
        "x": path(jax.random.split(k_feat, 9)),
        "m": path(jax.random.split(k_mask, 9)),
        "gamma": jnp.ones((out_channels,), jnp.float32),   # BatchNorm2d weight
        "beta": jnp.zeros((out_channels,), jnp.float32),   # BatchNorm2d bias
    }


# ----------------------------- reference ------------------------------------


def ref_forward(x_nchw, params, kernel_size, stride, padding, dilation,
                eps=1e-5, slope=0.2):
    x = jnp.transpose(x_nchw, (0, 2, 3, 1)).astype(jnp.float32)
    dn = ("NHWC", "HWIO", "NHWC")

    def proj_conv(p):
        y = lax.conv_general_dilated(x, p["w1"].reshape(1, 1, *p["w1"].shape),
                                     (1, 1), "VALID",
                                     dimension_numbers=dn) + p["b1"]
        y = lax.conv_general_dilated(y, p["w2"], (stride, stride),
                                     [(padding, padding), (padding, padding)],
                                     rhs_dilation=(dilation, dilation),
                                     dimension_numbers=dn) + p["b2"]
        y = lax.conv_general_dilated(y, p["w3"].reshape(1, 1, *p["w3"].shape),
                                     (1, 1), "VALID",
                                     dimension_numbers=dn) + p["b3"]
        return y

    xf = proj_conv(params["x"])
    mf = proj_conv(params["m"])
    mean = jnp.mean(xf, axis=(0, 1, 2), keepdims=True)
    var = jnp.mean((xf - mean) ** 2, axis=(0, 1, 2), keepdims=True)
    xn = (xf - mean) * lax.rsqrt(var + eps) \
         * params["gamma"].reshape(1, 1, 1, -1) + params["beta"].reshape(1, 1, 1, -1)
    act = jnp.where(xn > 0, xn, slope * xn)
    out = act * jax.nn.sigmoid(mf)
    return jnp.transpose(out, (0, 3, 1, 2))


# ----------------------------- main ------------------------------------------


if __name__ == "__main__":
    key = jax.random.PRNGKey(0)
    k_in, k_par = jax.random.split(key)

    N, Cin, H, W = 2, 8, 16, 16
    Cout, K, S, P, D = 8, 3, 1, 1, 1

    x = jax.random.normal(k_in, (N, Cin, H, W), jnp.float32)
    params = init_params(k_par, Cin, Cout, K, proj_ratio=4)
    y_ref = ref_forward(x, params, K, S, P, D)

    run = functools.partial(sn_gated_proj_conv2d, kernel_size=K, stride=S,
                            padding=P, dilation=D)

    # exact-math check (f32 MXU inputs + f32 intermediates) - tight tolerance
    y32 = jax.block_until_ready(
        jax.jit(functools.partial(run, compute_dtype=jnp.float32))(x, params))
    assert y32.shape == (N, Cout, H, W), y32.shape
    err32 = float(jnp.max(jnp.abs(y32 - y_ref)))
    assert jnp.allclose(y32, y_ref, rtol=2e-3, atol=2e-3), err32

    # perf-mode check (bf16 MXU inputs + bf16 stored intermediates, f32 accum).
    # Tolerance reflects bf16 quantization of the conv inputs/weights AND of the
    # stored pre-BN intermediates (amplified by the BN normalization); the exact
    # algorithm is verified by the f32 check above.
    y16 = jax.block_until_ready(
        jax.jit(functools.partial(run, compute_dtype=jnp.bfloat16))(x, params))
    err16 = float(jnp.max(jnp.abs(y16 - y_ref)))
    assert jnp.allclose(y16, y_ref, rtol=1e-1, atol=1e-1), err16

    print("KERNEL_OK")
</pallas_src>

<mosaic_0001>
module attributes {stable_mosaic.version = 11 : i64} {
  func.func @kernel(%arg0: i32, %arg1: memref<2x16x324xf32, #tpu.memory_space<vmem>>, %arg2: memref<9x16x16xf32, #tpu.memory_space<vmem>>, %arg3: memref<16x1xf32, #tpu.memory_space<vmem>>, %arg4: memref<1x286xf32, #tpu.memory_space<vmem>>, %arg5: memref<2x8x286xf32, #tpu.memory_space<vmem>>, %arg6: memref<2x8x286xf32, #tpu.memory_space<vmem>>, %arg7: memref<1x8x1xf32, #tpu.memory_space<vmem>>, %arg8: memref<1x8x1xf32, #tpu.memory_space<vmem>>) attributes {dimension_semantics = [#tpu.dimension_semantics<parallel>], iteration_bounds = array<i64: 1>, scalar_prefetch = 0 : i64, scratch_operands = 0 : i64, tpu.core_type = #tpu.core_type<tc>, window_params = [{transform_indices = @transform_0, window_bounds = array<i64: 2, 16, 324>}, {pipeline_mode = #tpu.pipeline_mode<synchronous>, transform_indices = @transform_1, window_bounds = array<i64: 9, 16, 16>}, {pipeline_mode = #tpu.pipeline_mode<synchronous>, transform_indices = @transform_2, window_bounds = array<i64: 16, 1>}, {pipeline_mode = #tpu.pipeline_mode<synchronous>, transform_indices = @transform_3, window_bounds = array<i64: 1, 286>}, {transform_indices = @transform_4, window_bounds = array<i64: 2, 8, 286>}, {transform_indices = @transform_5, window_bounds = array<i64: 2, 8, 286>}, {transform_indices = @transform_6, window_bounds = array<i64: 1, 8, 1>}, {transform_indices = @transform_7, window_bounds = array<i64: 1, 8, 1>}]} {
    %c0 = arith.constant 0 : index
    %c0_0 = arith.constant 0 : index
    %0 = vector.load %arg4[%c0, %c0_0] : memref<1x286xf32, #tpu.memory_space<vmem>>, vector<1x286xf32>
    %cst = arith.constant 0.000000e+00 : f32
    %1 = vector.broadcast %cst : f32 to vector<8x1xf32>
    %cst_1 = arith.constant 0.000000e+00 : f32
    %2 = vector.broadcast %cst_1 : f32 to vector<8x1xf32>
    %c0_2 = arith.constant 0 : index
    %c0_3 = arith.constant 0 : index
    %c0_4 = arith.constant 0 : index
    %3 = vector.load %arg2[%c0_2, %c0_3, %c0_4] : memref<9x16x16xf32, #tpu.memory_space<vmem>>, vector<1x16x16xf32>
    %4 = vector.shape_cast %3 : vector<1x16x16xf32> to vector<16x16xf32>
    %c0_5 = arith.constant 0 : index
    %c0_6 = arith.constant 0 : index
    %c0_7 = arith.constant 0 : index
    %5 = vector.load %arg1[%c0_5, %c0_6, %c0_7] : memref<2x16x324xf32, #tpu.memory_space<vmem>>, vector<1x16x286xf32>
    %6 = vector.shape_cast %5 : vector<1x16x286xf32> to vector<16x286xf32>
    %cst_8 = arith.constant dense<0.000000e+00> : vector<16x286xf32>
    %7 = tpu.matmul %4, %6, %cst_8 {dimension_numbers = #tpu.dot_dimension_numbers<[1], [0], [0], [1], [0, 0, 1, 1], [], []>} : vector<16x16xf32>, vector<16x286xf32>, vector<16x286xf32> -> vector<16x286xf32>
    %c1 = arith.constant 1 : index
    %c0_9 = arith.constant 0 : index
    %c0_10 = arith.constant 0 : index
    %8 = vector.load %arg2[%c1, %c0_9, %c0_10] : memref<9x16x16xf32, #tpu.memory_space<vmem>>, vector<1x16x16xf32>
    %9 = vector.shape_cast %8 : vector<1x16x16xf32> to vector<16x16xf32>
    %c0_11 = arith.constant 0 : index
    %c0_12 = arith.constant 0 : index
    %c1_13 = arith.constant 1 : index
    %10 = vector.load %arg1[%c0_11, %c0_12, %c1_13] : memref<2x16x324xf32, #tpu.memory_space<vmem>>, vector<1x16x286xf32>
    %11 = vector.shape_cast %10 : vector<1x16x286xf32> to vector<16x286xf32>
    %cst_14 = arith.constant dense<0.000000e+00> : vector<16x286xf32>
    %12 = tpu.matmul %9, %11, %cst_14 {dimension_numbers = #tpu.dot_dimension_numbers<[1], [0], [0], [1], [0, 0, 1, 1], [], []>} : vector<16x16xf32>, vector<16x286xf32>, vector<16x286xf32> -> vector<16x286xf32>
    %13 = arith.addf %7, %12 : vector<16x286xf32>
    %c2 = arith.constant 2 : index
    %c0_15 = arith.constant 0 : index
    %c0_16 = arith.constant 0 : index
    %14 = vector.load %arg2[%c2, %c0_15, %c0_16] : memref<9x16x16xf32, #tpu.memory_space<vmem>>, vector<1x16x16xf32>
    %15 = vector.shape_cast %14 : vector<1x16x16xf32> to vector<16x16xf32>
    %c0_17 = arith.constant 0 : index
    %c0_18 = arith.constant 0 : index
    %c2_19 = arith.constant 2 : index
    %16 = vector.load %arg1[%c0_17, %c0_18, %c2_19] : memref<2x16x324xf32, #tpu.memory_space<vmem>>, vector<1x16x286xf32>
    %17 = vector.shape_cast %16 : vector<1x16x286xf32> to vector<16x286xf32>
    %cst_20 = arith.constant dense<0.000000e+00> : vector<16x286xf32>
    %18 = tpu.matmul %15, %17, %cst_20 {dimension_numbers = #tpu.dot_dimension_numbers<[1], [0], [0], [1], [0, 0, 1, 1], [], []>} : vector<16x16xf32>, vector<16x286xf32>, vector<16x286xf32> -> vector<16x286xf32>
    %19 = arith.addf %13, %18 : vector<16x286xf32>
    %c3 = arith.constant 3 : index
    %c0_21 = arith.constant 0 : index
    %c0_22 = arith.constant 0 : index
    %20 = vector.load %arg2[%c3, %c0_21, %c0_22] : memref<9x16x16xf32, #tpu.memory_space<vmem>>, vector<1x16x16xf32>
    %21 = vector.shape_cast %20 : vector<1x16x16xf32> to vector<16x16xf32>
    %c0_23 = arith.constant 0 : index
    %c0_24 = arith.constant 0 : index
    %c18 = arith.constant 18 : index
    %22 = vector.load %arg1[%c0_23, %c0_24, %c18] : memref<2x16x324xf32, #tpu.memory_space<vmem>>, vector<1x16x286xf32>
    %23 = vector.shape_cast %22 : vector<1x16x286xf32> to vector<16x286xf32>
    %cst_25 = arith.constant dense<0.000000e+00> : vector<16x286xf32>
    %24 = tpu.matmul %21, %23, %cst_25 {dimension_numbers = #tpu.dot_dimension_numbers<[1], [0], [0], [1], [0, 0, 1, 1], [], []>} : vector<16x16xf32>, vector<16x286xf32>, vector<16x286xf32> -> vector<16x286xf32>
    %25 = arith.addf %19, %24 : vector<16x286xf32>
    %c4 = arith.constant 4 : index
    %c0_26 = arith.constant 0 : index
    %c0_27 = arith.constant 0 : index
    %26 = vector.load %arg2[%c4, %c0_26, %c0_27] : memref<9x16x16xf32, #tpu.memory_space<vmem>>, vector<1x16x16xf32>
    %27 = vector.shape_cast %26 : vector<1x16x16xf32> to vector<16x16xf32>
    %c0_28 = arith.constant 0 : index
    %c0_29 = arith.constant 0 : index
    %c19 = arith.constant 19 : index
    %28 = vector.load %arg1[%c0_28, %c0_29, %c19] : memref<2x16x324xf32, #tpu.memory_space<vmem>>, vector<1x16x286xf32>
    %29 = vector.shape_cast %28 : vector<1x16x286xf32> to vector<16x286xf32>
    %cst_30 = arith.constant dense<0.000000e+00> : vector<16x286xf32>
    %30 = tpu.matmul %27, %29, %cst_30 {dimension_numbers = #tpu.dot_dimension_numbers<[1], [0], [0], [1], [0, 0, 1, 1], [], []>} : vector<16x16xf32>, vector<16x286xf32>, vector<16x286xf32> -> vector<16x286xf32>
    %31 = arith.addf %25, %30 : vector<16x286xf32>
    %c5 = arith.constant 5 : index
    %c0_31 = arith.constant 0 : index
    %c0_32 = arith.constant 0 : index
    %32 = vector.load %arg2[%c5, %c0_31, %c0_32] : memref<9x16x16xf32, #tpu.memory_space<vmem>>, vector<1x16x16xf32>
    %33 = vector.shape_cast %32 : vector<1x16x16xf32> to vector<16x16xf32>
    %c0_33 = arith.constant 0 : index
    %c0_34 = arith.constant 0 : index
    %c20 = arith.constant 20 : index
    %34 = vector.load %arg1[%c0_33, %c0_34, %c20] : memref<2x16x324xf32, #tpu.memory_space<vmem>>, vector<1x16x286xf32>
    %35 = vector.shape_cast %34 : vector<1x16x286xf32> to vector<16x286xf32>
    %cst_35 = arith.constant dense<0.000000e+00> : vector<16x286xf32>
    %36 = tpu.matmul %33, %35, %cst_35 {dimension_numbers = #tpu.dot_dimension_numbers<[1], [0], [0], [1], [0, 0, 1, 1], [], []>} : vector<16x16xf32>, vector<16x286xf32>, vector<16x286xf32> -> vector<16x286xf32>
    %37 = arith.addf %31, %36 : vector<16x286xf32>
    %c6 = arith.constant 6 : index
    %c0_36 = arith.constant 0 : index
    %c0_37 = arith.constant 0 : index
    %38 = vector.load %arg2[%c6, %c0_36, %c0_37] : memref<9x16x16xf32, #tpu.memory_space<vmem>>, vector<1x16x16xf32>
    %39 = vector.shape_cast %38 : vector<1x16x16xf32> to vector<16x16xf32>
    %c0_38 = arith.constant 0 : index
    %c0_39 = arith.constant 0 : index
    %c36 = arith.constant 36 : index
    %40 = vector.load %arg1[%c0_38, %c0_39, %c36] : memref<2x16x324xf32, #tpu.memory_space<vmem>>, vector<1x16x286xf32>
    %41 = vector.shape_cast %40 : vector<1x16x286xf32> to vector<16x286xf32>
    %cst_40 = arith.constant dense<0.000000e+00> : vector<16x286xf32>
    %42 = tpu.matmul %39, %41, %cst_40 {dimension_numbers = #tpu.dot_dimension_numbers<[1], [0], [0], [1], [0, 0, 1, 1], [], []>} : vector<16x16xf32>, vector<16x286xf32>, vector<16x286xf32> -> vector<16x286xf32>
    %43 = arith.addf %37, %42 : vector<16x286xf32>
    %c7 = arith.constant 7 : index
    %c0_41 = arith.constant 0 : index
    %c0_42 = arith.constant 0 : index
    %44 = vector.load %arg2[%c7, %c0_41, %c0_42] : memref<9x16x16xf32, #tpu.memory_space<vmem>>, vector<1x16x16xf32>
    %45 = vector.shape_cast %44 : vector<1x16x16xf32> to vector<16x16xf32>
    %c0_43 = arith.constant 0 : index
    %c0_44 = arith.constant 0 : index
    %c37 = arith.constant 37 : index
    %46 = vector.load %arg1[%c0_43, %c0_44, %c37] : memref<2x16x324xf32, #tpu.memory_space<vmem>>, vector<1x16x286xf32>
    %47 = vector.shape_cast %46 : vector<1x16x286xf32> to vector<16x286xf32>
    %cst_45 = arith.constant dense<0.000000e+00> : vector<16x286xf32>
    %48 = tpu.matmul %45, %47, %cst_45 {dimension_numbers = #tpu.dot_dimension_numbers<[1], [0], [0], [1], [0, 0, 1, 1], [], []>} : vector<16x16xf32>, vector<16x286xf32>, vector<16x286xf32> -> vector<16x286xf32>
    %49 = arith.addf %43, %48 : vector<16x286xf32>
    %c8 = arith.constant 8 : index
    %c0_46 = arith.constant 0 : index
    %c0_47 = arith.constant 0 : index
    %50 = vector.load %arg2[%c8, %c0_46, %c0_47] : memref<9x16x16xf32, #tpu.memory_space<vmem>>, vector<1x16x16xf32>
    %51 = vector.shape_cast %50 : vector<1x16x16xf32> to vector<16x16xf32>
    %c0_48 = arith.constant 0 : index
    %c0_49 = arith.constant 0 : index
    %c38 = arith.constant 38 : index
    %52 = vector.load %arg1[%c0_48, %c0_49, %c38] : memref<2x16x324xf32, #tpu.memory_space<vmem>>, vector<1x16x286xf32>
    %53 = vector.shape_cast %52 : vector<1x16x286xf32> to vector<16x286xf32>
    %cst_50 = arith.constant dense<0.000000e+00> : vector<16x286xf32>
    %54 = tpu.matmul %51, %53, %cst_50 {dimension_numbers = #tpu.dot_dimension_numbers<[1], [0], [0], [1], [0, 0, 1, 1], [], []>} : vector<16x16xf32>, vector<16x286xf32>, vector<16x286xf32> -> vector<16x286xf32>
    %55 = arith.addf %49, %54 : vector<16x286xf32>
    %c0_51 = arith.constant 0 : index
    %c0_52 = arith.constant 0 : index
    %56 = vector.load %arg3[%c0_51, %c0_52] : memref<16x1xf32, #tpu.memory_space<vmem>>, vector<16x1xf32>
    %57 = vector.broadcast %56 : vector<16x1xf32> to vector<16x286xf32>
    %58 = arith.addf %55, %57 : vector<16x286xf32>
    %59 = vector.extract_strided_slice %58 {offsets = [0, 0], sizes = [8, 286], strides = [1, 1]} : vector<16x286xf32> to vector<8x286xf32>
    %60 = vector.extract_strided_slice %58 {offsets = [8, 0], sizes = [8, 286], strides = [1, 1]} : vector<16x286xf32> to vector<8x286xf32>
    %c0_53 = arith.constant 0 : index
    %c0_54 = arith.constant 0 : index
    %c0_55 = arith.constant 0 : index
    %61 = vector.load %arg5[%c0_53, %c0_54, %c0_55] : memref<2x8x286xf32, #tpu.memory_space<vmem>>, vector<1x8x286xf32>
    %62 = vector.shape_cast %61 : vector<1x8x286xf32> to vector<8x286xf32>
    %63 = vector.shape_cast %59 : vector<8x286xf32> to vector<1x8x286xf32>
    tpu.vector_store %arg5[%c0_53, %c0_54, %c0_55], %63 {strides = array<i32>} : memref<2x8x286xf32, #tpu.memory_space<vmem>>, vector<1x8x286xf32>,
    %64 = arith.negf %60 : vector<8x286xf32>
    %65 = math.exp %64 : vector<8x286xf32>
    %cst_56 = arith.constant 1.000000e+00 : f32
    %66 = vector.broadcast %cst_56 : f32 to vector<8x286xf32>
    %67 = arith.addf %66, %65 : vector<8x286xf32>
    %68 = arith.divf %66, %67 : vector<8x286xf32>
    %c0_57 = arith.constant 0 : index
    %c0_58 = arith.constant 0 : index
    %c0_59 = arith.constant 0 : index
    %69 = vector.load %arg6[%c0_57, %c0_58, %c0_59] : memref<2x8x286xf32, #tpu.memory_space<vmem>>, vector<1x8x286xf32>
    %70 = vector.shape_cast %69 : vector<1x8x286xf32> to vector<8x286xf32>
    %71 = vector.shape_cast %68 : vector<8x286xf32> to vector<1x8x286xf32>
    tpu.vector_store %arg6[%c0_57, %c0_58, %c0_59], %71 {strides = array<i32>} : memref<2x8x286xf32, #tpu.memory_space<vmem>>, vector<1x8x286xf32>,
    %72 = vector.broadcast %0 : vector<1x286xf32> to vector<8x286xf32>
    %73 = arith.mulf %59, %72 : vector<8x286xf32>
    %cst_60 = arith.constant dense<0.000000e+00> : vector<8xf32>
    %74 = vector.multi_reduction <add>, %73, %cst_60 [1] : vector<8x286xf32> to vector<8xf32>
    %75 = vector.shape_cast %74 : vector<8xf32> to vector<8x1xf32>
    %76 = arith.addf %1, %75 : vector<8x1xf32>
    %77 = arith.mulf %59, %73 : vector<8x286xf32>
    %cst_61 = arith.constant dense<0.000000e+00> : vector<8xf32>
    %78 = vector.multi_reduction <add>, %77, %cst_61 [1] : vector<8x286xf32> to vector<8xf32>
    %79 = vector.shape_cast %78 : vector<8xf32> to vector<8x1xf32>
    %80 = arith.addf %2, %79 : vector<8x1xf32>
    %c0_62 = arith.constant 0 : index
    %c0_63 = arith.constant 0 : index
    %c0_64 = arith.constant 0 : index
    %81 = vector.load %arg2[%c0_62, %c0_63, %c0_64] : memref<9x16x16xf32, #tpu.memory_space<vmem>>, vector<1x16x16xf32>
    %82 = vector.shape_cast %81 : vector<1x16x16xf32> to vector<16x16xf32>
    %c1_65 = arith.constant 1 : index
    %c0_66 = arith.constant 0 : index
    %c0_67 = arith.constant 0 : index
    %83 = vector.load %arg1[%c1_65, %c0_66, %c0_67] : memref<2x16x324xf32, #tpu.memory_space<vmem>>, vector<1x16x286xf32>
    %84 = vector.shape_cast %83 : vector<1x16x286xf32> to vector<16x286xf32>
    %cst_68 = arith.constant dense<0.000000e+00> : vector<16x286xf32>
    %85 = tpu.matmul %82, %84, %cst_68 {dimension_numbers = #tpu.dot_dimension_numbers<[1], [0], [0], [1], [0, 0, 1, 1], [], []>} : vector<16x16xf32>, vector<16x286xf32>, vector<16x286xf32> -> vector<16x286xf32>
    %c1_69 = arith.constant 1 : index
    %c0_70 = arith.constant 0 : index
    %c0_71 = arith.constant 0 : index
    %86 = vector.load %arg2[%c1_69, %c0_70, %c0_71] : memref<9x16x16xf32, #tpu.memory_space<vmem>>, vector<1x16x16xf32>
    %87 = vector.shape_cast %86 : vector<1x16x16xf32> to vector<16x16xf32>
    %c1_72 = arith.constant 1 : index
    %c0_73 = arith.constant 0 : index
    %c1_74 = arith.constant 1 : index
    %88 = vector.load %arg1[%c1_72, %c0_73, %c1_74] : memref<2x16x324xf32, #tpu.memory_space<vmem>>, vector<1x16x286xf32>
    %89 = vector.shape_cast %88 : vector<1x16x286xf32> to vector<16x286xf32>
    %cst_75 = arith.constant dense<0.000000e+00> : vector<16x286xf32>
    %90 = tpu.matmul %87, %89, %cst_75 {dimension_numbers = #tpu.dot_dimension_numbers<[1], [0], [0], [1], [0, 0, 1, 1], [], []>} : vector<16x16xf32>, vector<16x286xf32>, vector<16x286xf32> -> vector<16x286xf32>
    %91 = arith.addf %85, %90 : vector<16x286xf32>
    %c2_76 = arith.constant 2 : index
    %c0_77 = arith.constant 0 : index
    %c0_78 = arith.constant 0 : index
    %92 = vector.load %arg2[%c2_76, %c0_77, %c0_78] : memref<9x16x16xf32, #tpu.memory_space<vmem>>, vector<1x16x16xf32>
    %93 = vector.shape_cast %92 : vector<1x16x16xf32> to vector<16x16xf32>
    %c1_79 = arith.constant 1 : index
    %c0_80 = arith.constant 0 : index
    %c2_81 = arith.constant 2 : index
    %94 = vector.load %arg1[%c1_79, %c0_80, %c2_81] : memref<2x16x324xf32, #tpu.memory_space<vmem>>, vector<1x16x286xf32>
    %95 = vector.shape_cast %94 : vector<1x16x286xf32> to vector<16x286xf32>
    %cst_82 = arith.constant dense<0.000000e+00> : vector<16x286xf32>
    %96 = tpu.matmul %93, %95, %cst_82 {dimension_numbers = #tpu.dot_dimension_numbers<[1], [0], [0], [1], [0, 0, 1, 1], [], []>} : vector<16x16xf32>, vector<16x286xf32>, vector<16x286xf32> -> vector<16x286xf32>
    %97 = arith.addf %91, %96 : vector<16x286xf32>
    %c3_83 = arith.constant 3 : index
    %c0_84 = arith.constant 0 : index
    %c0_85 = arith.constant 0 : index
    %98 = vector.load %arg2[%c3_83, %c0_84, %c0_85] : memref<9x16x16xf32, #tpu.memory_space<vmem>>, vector<1x16x16xf32>
    %99 = vector.shape_cast %98 : vector<1x16x16xf32> to vector<16x16xf32>
    %c1_86 = arith.constant 1 : index
    %c0_87 = arith.constant 0 : index
    %c18_88 = arith.constant 18 : index
    %100 = vector.load %arg1[%c1_86, %c0_87, %c18_88] : memref<2x16x324xf32, #tpu.memory_space<vmem>>, vector<1x16x286xf32>
    %101 = vector.shape_cast %100 : vector<1x16x286xf32> to vector<16x286xf32>
    %cst_89 = arith.constant dense<0.000000e+00> : vector<16x286xf32>
    %102 = tpu.matmul %99, %101, %cst_89 {dimension_numbers = #tpu.dot_dimension_numbers<[1], [0], [0], [1], [0, 0, 1, 1], [], []>} : vector<16x16xf32>, vector<16x286xf32>, vector<16x286xf32> -> vector<16x286xf32>
    %103 = arith.addf %97, %102 : vector<16x286xf32>
    %c4_90 = arith.constant 4 : index
    %c0_91 = arith.constant 0 : index
    %c0_92 = arith.constant 0 : index
    %104 = vector.load %arg2[%c4_90, %c0_91, %c0_92] : memref<9x16x16xf32, #tpu.memory_space<vmem>>, vector<1x16x16xf32>
    %105 = vector.shape_cast %104 : vector<1x16x16xf32> to vector<16x16xf32>
    %c1_93 = arith.constant 1 : index
    %c0_94 = arith.constant 0 : index
    %c19_95 = arith.constant 19 : index
    %106 = vector.load %arg1[%c1_93, %c0_94, %c19_95] : memref<2x16x324xf32, #tpu.memory_space<vmem>>, vector<1x16x286xf32>
    %107 = vector.shape_cast %106 : vector<1x16x286xf32> to vector<16x286xf32>
    %cst_96 = arith.constant dense<0.000000e+00> : vector<16x286xf32>
    %108 = tpu.matmul %105, %107, %cst_96 {dimension_numbers = #tpu.dot_dimension_numbers<[1], [0], [0], [1], [0, 0, 1, 1], [], []>} : vector<16x16xf32>, vector<16x286xf32>, vector<16x286xf32> -> vector<16x286xf32>
    %109 = arith.addf %103, %108 : vector<16x286xf32>
    %c5_97 = arith.constant 5 : index
    %c0_98 = arith.constant 0 : index
    %c0_99 = arith.constant 0 : index
    %110 = vector.load %arg2[%c5_97, %c0_98, %c0_99] : memref<9x16x16xf32, #tpu.memory_space<vmem>>, vector<1x16x16xf32>
    %111 = vector.shape_cast %110 : vector<1x16x16xf32> to vector<16x16xf32>
    %c1_100 = arith.constant 1 : index
    %c0_101 = arith.constant 0 : index
    %c20_102 = arith.constant 20 : index
    %112 = vector.load %arg1[%c1_100, %c0_101, %c20_102] : memref<2x16x324xf32, #tpu.memory_space<vmem>>, vector<1x16x286xf32>
    %113 = vector.shape_cast %112 : vector<1x16x286xf32> to vector<16x286xf32>
    %cst_103 = arith.constant dense<0.000000e+00> : vector<16x286xf32>
    %114 = tpu.matmul %111, %113, %cst_103 {dimension_numbers = #tpu.dot_dimension_numbers<[1], [0], [0], [1], [0, 0, 1, 1], [], []>} : vector<16x16xf32>, vector<16x286xf32>, vector<16x286xf32> -> vector<16x286xf32>
    %115 = arith.addf %109, %114 : vector<16x286xf32>
    %c6_104 = arith.constant 6 : index
    %c0_105 = arith.constant 0 : index
    %c0_106 = arith.constant 0 : index
    %116 = vector.load %arg2[%c6_104, %c0_105, %c0_106] : memref<9x16x16xf32, #tpu.memory_space<vmem>>, vector<1x16x16xf32>
    %117 = vector.shape_cast %116 : vector<1x16x16xf32> to vector<16x16xf32>
    %c1_107 = arith.constant 1 : index
    %c0_108 = arith.constant 0 : index
    %c36_109 = arith.constant 36 : index
    %118 = vector.load %arg1[%c1_107, %c0_108, %c36_109] : memref<2x16x324xf32, #tpu.memory_space<vmem>>, vector<1x16x286xf32>
    %119 = vector.shape_cast %118 : vector<1x16x286xf32> to vector<16x286xf32>
    %cst_110 = arith.constant dense<0.000000e+00> : vector<16x286xf32>
    %120 = tpu.matmul %117, %119, %cst_110 {dimension_numbers = #tpu.dot_dimension_numbers<[1], [0], [0], [1], [0, 0, 1, 1], [], []>} : vector<16x16xf32>, vector<16x286xf32>, vector<16x286xf32> -> vector<16x286xf32>
    %121 = arith.addf %115, %120 : vector<16x286xf32>
    %c7_111 = arith.constant 7 : index
    %c0_112 = arith.constant 0 : index
    %c0_113 = arith.constant 0 : index
    %122 = vector.load %arg2[%c7_111, %c0_112, %c0_113] : memref<9x16x16xf32, #tpu.memory_space<vmem>>, vector<1x16x16xf32>
    %123 = vector.shape_cast %122 : vector<1x16x16xf32> to vector<16x16xf32>
    %c1_114 = arith.constant 1 : index
    %c0_115 = arith.constant 0 : index
    %c37_116 = arith.constant 37 : index
    %124 = vector.load %arg1[%c1_114, %c0_115, %c37_116] : memref<2x16x324xf32, #tpu.memory_space<vmem>>, vector<1x16x286xf32>
    %125 = vector.shape_cast %124 : vector<1x16x286xf32> to vector<16x286xf32>
    %cst_117 = arith.constant dense<0.000000e+00> : vector<16x286xf32>
    %126 = tpu.matmul %123, %125, %cst_117 {dimension_numbers = #tpu.dot_dimension_numbers<[1], [0], [0], [1], [0, 0, 1, 1], [], []>} : vector<16x16xf32>, vector<16x286xf32>, vector<16x286xf32> -> vector<16x286xf32>
    %127 = arith.addf %121, %126 : vector<16x286xf32>
    %c8_118 = arith.constant 8 : index
    %c0_119 = arith.constant 0 : index
    %c0_120 = arith.constant 0 : index
    %128 = vector.load %arg2[%c8_118, %c0_119, %c0_120] : memref<9x16x16xf32, #tpu.memory_space<vmem>>, vector<1x16x16xf32>
    %129 = vector.shape_cast %128 : vector<1x16x16xf32> to vector<16x16xf32>
    %c1_121 = arith.constant 1 : index
    %c0_122 = arith.constant 0 : index
    %c38_123 = arith.constant 38 : index
    %130 = vector.load %arg1[%c1_121, %c0_122, %c38_123] : memref<2x16x324xf32, #tpu.memory_space<vmem>>, vector<1x16x286xf32>
    %131 = vector.shape_cast %130 : vector<1x16x286xf32> to vector<16x286xf32>
    %cst_124 = arith.constant dense<0.000000e+00> : vector<16x286xf32>
    %132 = tpu.matmul %129, %131, %cst_124 {dimension_numbers = #tpu.dot_dimension_numbers<[1], [0], [0], [1], [0, 0, 1, 1], [], []>} : vector<16x16xf32>, vector<16x286xf32>, vector<16x286xf32> -> vector<16x286xf32>
    %133 = arith.addf %127, %132 : vector<16x286xf32>
    %c0_125 = arith.constant 0 : index
    %c0_126 = arith.constant 0 : index
    %134 = vector.load %arg3[%c0_125, %c0_126] : memref<16x1xf32, #tpu.memory_space<vmem>>, vector<16x1xf32>
    %135 = vector.broadcast %134 : vector<16x1xf32> to vector<16x286xf32>
    %136 = arith.addf %133, %135 : vector<16x286xf32>
    %137 = vector.extract_strided_slice %136 {offsets = [0, 0], sizes = [8, 286], strides = [1, 1]} : vector<16x286xf32> to vector<8x286xf32>
    %138 = vector.extract_strided_slice %136 {offsets = [8, 0], sizes = [8, 286], strides = [1, 1]} : vector<16x286xf32> to vector<8x286xf32>
    %c1_127 = arith.constant 1 : index
    %c0_128 = arith.constant 0 : index
    %c0_129 = arith.constant 0 : index
    %139 = vector.load %arg5[%c1_127, %c0_128, %c0_129] : memref<2x8x286xf32, #tpu.memory_space<vmem>>, vector<1x8x286xf32>
    %140 = vector.shape_cast %139 : vector<1x8x286xf32> to vector<8x286xf32>
    %141 = vector.shape_cast %137 : vector<8x286xf32> to vector<1x8x286xf32>
    tpu.vector_store %arg5[%c1_127, %c0_128, %c0_129], %141 {strides = array<i32>} : memref<2x8x286xf32, #tpu.memory_space<vmem>>, vector<1x8x286xf32>,
    %142 = arith.negf %138 : vector<8x286xf32>
    %143 = math.exp %142 : vector<8x286xf32>
    %cst_130 = arith.constant 1.000000e+00 : f32
    %144 = vector.broadcast %cst_130 : f32 to vector<8x286xf32>
    %145 = arith.addf %144, %143 : vector<8x286xf32>
    %146 = arith.divf %144, %145 : vector<8x286xf32>
    %c1_131 = arith.constant 1 : index
    %c0_132 = arith.constant 0 : index
    %c0_133 = arith.constant 0 : index
    %147 = vector.load %arg6[%c1_131, %c0_132, %c0_133] : memref<2x8x286xf32, #tpu.memory_space<vmem>>, vector<1x8x286xf32>
    %148 = vector.shape_cast %147 : vector<1x8x286xf32> to vector<8x286xf32>
    %149 = vector.shape_cast %146 : vector<8x286xf32> to vector<1x8x286xf32>
    tpu.vector_store %arg6[%c1_131, %c0_132, %c0_133], %149 {strides = array<i32>} : memref<2x8x286xf32, #tpu.memory_space<vmem>>, vector<1x8x286xf32>,
    %150 = vector.broadcast %0 : vector<1x286xf32> to vector<8x286xf32>
    %151 = arith.mulf %137, %150 : vector<8x286xf32>
    %cst_134 = arith.constant dense<0.000000e+00> : vector<8xf32>
    %152 = vector.multi_reduction <add>, %151, %cst_134 [1] : vector<8x286xf32> to vector<8xf32>
    %153 = vector.shape_cast %152 : vector<8xf32> to vector<8x1xf32>
    %154 = arith.addf %76, %153 : vector<8x1xf32>
    %155 = arith.mulf %137, %151 : vector<8x286xf32>
    %cst_135 = arith.constant dense<0.000000e+00> : vector<8xf32>
    %156 = vector.multi_reduction <add>, %155, %cst_135 [1] : vector<8x286xf32> to vector<8xf32>
    %157 = vector.shape_cast %156 : vector<8xf32> to vector<8x1xf32>
    %158 = arith.addf %80, %157 : vector<8x1xf32>
    %c0_136 = arith.constant 0 : index
    %c0_137 = arith.constant 0 : index
    %c0_138 = arith.constant 0 : index
    %159 = vector.load %arg7[%c0_136, %c0_137, %c0_138] : memref<1x8x1xf32, #tpu.memory_space<vmem>>, vector<1x8x1xf32>
    %160 = vector.shape_cast %159 : vector<1x8x1xf32> to vector<8x1xf32>
    %161 = vector.shape_cast %154 : vector<8x1xf32> to vector<1x8x1xf32>
    tpu.vector_store %arg7[%c0_136, %c0_137, %c0_138], %161 {strides = array<i32>} : memref<1x8x1xf32, #tpu.memory_space<vmem>>, vector<1x8x1xf32>,
    %c0_139 = arith.constant 0 : index
    %c0_140 = arith.constant 0 : index
    %c0_141 = arith.constant 0 : index
    %162 = vector.load %arg8[%c0_139, %c0_140, %c0_141] : memref<1x8x1xf32, #tpu.memory_space<vmem>>, vector<1x8x1xf32>
    %163 = vector.shape_cast %162 : vector<1x8x1xf32> to vector<8x1xf32>
    %164 = vector.shape_cast %158 : vector<8x1xf32> to vector<1x8x1xf32>
    tpu.vector_store %arg8[%c0_139, %c0_140, %c0_141], %164 {strides = array<i32>} : memref<1x8x1xf32, #tpu.memory_space<vmem>>, vector<1x8x1xf32>,
    return
  }
  func.func @transform_0(%arg0: i32) -> (i32, i32, i32) {
    %c0_i32 = arith.constant 0 : i32
    %c0_i32_0 = arith.constant 0 : i32
    %c0_i32_1 = arith.constant 0 : i32
    return %arg0, %c0_i32, %c0_i32_0 : i32, i32, i32
  }
  func.func @transform_1(%arg0: i32) -> (i32, i32, i32) {
    %c0_i32 = arith.constant 0 : i32
    %c0_i32_0 = arith.constant 0 : i32
    %c0_i32_1 = arith.constant 0 : i32
    %c0_i32_2 = arith.constant 0 : i32
    return %c0_i32, %c0_i32_0, %c0_i32_1 : i32, i32, i32
  }
  func.func @transform_2(%arg0: i32) -> (i32, i32) {
    %c0_i32 = arith.constant 0 : i32
    %c0_i32_0 = arith.constant 0 : i32
    %c0_i32_1 = arith.constant 0 : i32
    return %c0_i32, %c0_i32_0 : i32, i32
  }
  func.func @transform_3(%arg0: i32) -> (i32, i32) {
    %c0_i32 = arith.constant 0 : i32
    %c0_i32_0 = arith.constant 0 : i32
    %c0_i32_1 = arith.constant 0 : i32
    return %c0_i32, %c0_i32_0 : i32, i32
  }
  func.func @transform_4(%arg0: i32) -> (i32, i32, i32) {
    %c0_i32 = arith.constant 0 : i32
    %c0_i32_0 = arith.constant 0 : i32
    %c0_i32_1 = arith.constant 0 : i32
    return %arg0, %c0_i32, %c0_i32_0 : i32, i32, i32
  }
  func.func @transform_5(%arg0: i32) -> (i32, i32, i32) {
    %c0_i32 = arith.constant 0 : i32
    %c0_i32_0 = arith.constant 0 : i32
    %c0_i32_1 = arith.constant 0 : i32
    return %arg0, %c0_i32, %c0_i32_0 : i32, i32, i32
  }
  func.func @transform_6(%arg0: i32) -> (i32, i32, i32) {
    %c0_i32 = arith.constant 0 : i32
    %c0_i32_0 = arith.constant 0 : i32
    %c0_i32_1 = arith.constant 0 : i32
    return %arg0, %c0_i32, %c0_i32_0 : i32, i32, i32
  }
  func.func @transform_7(%arg0: i32) -> (i32, i32, i32) {
    %c0_i32 = arith.constant 0 : i32
    %c0_i32_0 = arith.constant 0 : i32
    %c0_i32_1 = arith.constant 0 : i32
    return %arg0, %c0_i32, %c0_i32_0 : i32, i32, i32
  }
}

module attributes {stable_mosaic.version = 11 : i64} {
  func.func @kernel(%arg0: i32, %arg1: i32, %arg2: memref<2x8x286xf32, #tpu.memory_space<vmem>>, %arg3: memref<2x8x286xf32, #tpu.memory_space<vmem>>, %arg4: memref<8x1xf32, #tpu.memory_space<vmem>>, %arg5: memref<8x1xf32, #tpu.memory_space<vmem>>, %arg6: memref<2x8x286xf32, #tpu.memory_space<vmem>>) attributes {dimension_semantics = [#tpu.dimension_semantics<parallel>, #tpu.dimension_semantics<parallel>], iteration_bounds = array<i64: 1, 1>, scalar_prefetch = 0 : i64, scratch_operands = 0 : i64, tpu.core_type = #tpu.core_type<tc>, window_params = [{transform_indices = @transform_0, window_bounds = array<i64: 2, 8, 286>}, {transform_indices = @transform_1, window_bounds = array<i64: 2, 8, 286>}, {pipeline_mode = #tpu.pipeline_mode<synchronous>, transform_indices = @transform_2, window_bounds = array<i64: 8, 1>}, {pipeline_mode = #tpu.pipeline_mode<synchronous>, transform_indices = @transform_3, window_bounds = array<i64: 8, 1>}, {transform_indices = @transform_4, window_bounds = array<i64: 2, 8, 286>}]} {
    %c0 = arith.constant 0 : index
    %c0_0 = arith.constant 0 : index
    %c0_1 = arith.constant 0 : index
    %0 = vector.load %arg2[%c0, %c0_0, %c0_1] : memref<2x8x286xf32, #tpu.memory_space<vmem>>, vector<2x8x286xf32>
    %c0_2 = arith.constant 0 : index
    %c0_3 = arith.constant 0 : index
    %1 = vector.load %arg4[%c0_2, %c0_3] : memref<8x1xf32, #tpu.memory_space<vmem>>, vector<8x1xf32>
    %2 = vector.shape_cast %1 : vector<8x1xf32> to vector<1x8x1xf32>
    %3 = vector.broadcast %2 : vector<1x8x1xf32> to vector<2x8x286xf32>
    %4 = arith.mulf %0, %3 : vector<2x8x286xf32>
    %c0_4 = arith.constant 0 : index
    %c0_5 = arith.constant 0 : index
    %5 = vector.load %arg5[%c0_4, %c0_5] : memref<8x1xf32, #tpu.memory_space<vmem>>, vector<8x1xf32>
    %6 = vector.shape_cast %5 : vector<8x1xf32> to vector<1x8x1xf32>
    %7 = vector.broadcast %6 : vector<1x8x1xf32> to vector<2x8x286xf32>
    %8 = arith.addf %4, %7 : vector<2x8x286xf32>
    %cst = arith.constant 0.000000e+00 : f32
    %9 = vector.broadcast %cst : f32 to vector<2x8x286xf32>
    %10 = arith.cmpf ogt, %8, %9 : vector<2x8x286xf32>
    %cst_6 = arith.constant 2.000000e-01 : f32
    %11 = vector.broadcast %cst_6 : f32 to vector<2x8x286xf32>
    %12 = arith.mulf %11, %8 : vector<2x8x286xf32>
    %13 = arith.select %10, %8, %12 : vector<2x8x286xi1>, vector<2x8x286xf32>
    %c0_7 = arith.constant 0 : index
    %c0_8 = arith.constant 0 : index
    %c0_9 = arith.constant 0 : index
    %14 = vector.load %arg3[%c0_7, %c0_8, %c0_9] : memref<2x8x286xf32, #tpu.memory_space<vmem>>, vector<2x8x286xf32>
    %15 = arith.mulf %13, %14 : vector<2x8x286xf32>
    %c0_10 = arith.constant 0 : index
    %c0_11 = arith.constant 0 : index
    %c0_12 = arith.constant 0 : index
    %16 = vector.load %arg6[%c0_10, %c0_11, %c0_12] : memref<2x8x286xf32, #tpu.memory_space<vmem>>, vector<2x8x286xf32>
    tpu.vector_store %arg6[%c0_10, %c0_11, %c0_12], %15 {strides = array<i32>} : memref<2x8x286xf32, #tpu.memory_space<vmem>>, vector<2x8x286xf32>,
    return
  }
  func.func @transform_0(%arg0: i32, %arg1: i32) -> (i32, i32, i32) {
    %c0_i32 = arith.constant 0 : i32
    %c0_i32_0 = arith.constant 0 : i32
    return %arg0, %c0_i32, %arg1 : i32, i32, i32
  }
  func.func @transform_1(%arg0: i32, %arg1: i32) -> (i32, i32, i32) {
    %c0_i32 = arith.constant 0 : i32
    %c0_i32_0 = arith.constant 0 : i32
    return %arg0, %c0_i32, %arg1 : i32, i32, i32
  }
  func.func @transform_2(%arg0: i32, %arg1: i32) -> (i32, i32) {
    %c0_i32 = arith.constant 0 : i32
    %c0_i32_0 = arith.constant 0 : i32
    %c0_i32_1 = arith.constant 0 : i32
    return %c0_i32, %c0_i32_0 : i32, i32
  }
  func.func @transform_3(%arg0: i32, %arg1: i32) -> (i32, i32) {
    %c0_i32 = arith.constant 0 : i32
    %c0_i32_0 = arith.constant 0 : i32
    %c0_i32_1 = arith.constant 0 : i32
    return %c0_i32, %c0_i32_0 : i32, i32
  }
  func.func @transform_4(%arg0: i32, %arg1: i32) -> (i32, i32, i32) {
    %c0_i32 = arith.constant 0 : i32
    %c0_i32_0 = arith.constant 0 : i32
    return %arg0, %c0_i32, %arg1 : i32, i32, i32
  }
}

</mosaic_0001>

<bundles_post_ra>
// kernel: sn_gated_proj_conv2d.3
= control target key start
LH: loop header
LB: loop body
LE: loop exit
PB: predicated region body
PF: predicated region fallthrough
CT: control target
= control target key end

     0   :  { %v90_v0 = vmov 0   ;;  %vm79_vm6 = vcmask 244736   ;;  %s184_s2 = inlined_call_operand.vmem [shape: f32[8,1], index: 2, kind: input, shape index: {}]   ;;  %s185_s3 = inlined_call_operand.vmem [shape: f32[8,1], index: 3, kind: input, shape index: {}]   ;;  %s186_s0 = inlined_call_operand.vmem [shape: f32[2,8,286], index: 0, kind: input, shape index: {}, may-alias: {0,4}]   ;;  %s187_s1 = inlined_call_operand.vmem [shape: f32[2,8,286], index: 1, kind: input, shape index: {}]   ;;  %s188_s4 = inlined_call_operand.vmem [shape: f32[2,8,286], index: 4, kind: output, shape index: {}, may-alias: {0,4}]  }
   0x1   :  { %89 = vset.pattern.permute.xlu0 %v90_v0  ;;  %v23_v1 = vld [vmem:[%s184_s2] sm:$0xff]  ;;  %v18_v5 = vld [vmem:[%s186_s0 + $0x8] sm:$0xff]  ;;  %v19_v6 = vld [vmem:[%s186_s0 + $0x10] sm:$0xff] }
   0x2   :  { %26 = vperm.xlu0 %89, %v23_v1   ;;  %v35_v2 = vld [vmem:[%s185_s3] sm:$0xff]  ;;  %v20_v7 = vld [vmem:[%s186_s0 + $0x18] sm:$0xff]  ;;  %v22_v9 = vld [vmem:[%s186_s0 + $0x28] sm:$0xff] }
   0x3   :  { %v17_v3 = vld [vmem:[%s186_s0] sm:$0xff]  ;;  %v66_v24 = vld [vmem:[%s187_s1 + $0x8] sm:$0xff]  ;;  %v67_v25 = vld [vmem:[%s187_s1 + $0x10] sm:$0xff] }
   0x4   :  { %v21_v8 = vld [vmem:[%s186_s0 + $0x20] sm:$0xff]  ;;  %v68_v26 = vld [vmem:[%s187_s1 + $0x18] sm:$0xff]  ;;  %v70_v36 = vld [vmem:[%s187_s1 + $0x28] sm:$0xff] }
   0x5   :  { %v65_v23 = vld [vmem:[%s187_s1] sm:$0xff] }
   0x6   :  { %38 = vperm.xlu0 %89, %v35_v2   ;;  %v69_v35 = vld [vmem:[%s187_s1 + $0x20] sm:$0xff] }
  0x81   :  { %v27_v4 = vpop.permute.xlu0 %26 }
  0x82   :  { %v29_v10 = vmul.f32 %v27_v4, %v17_v3  ;;  %v30_v11 = vmul.f32 %v27_v4, %v18_v5  ;;  %v31_v12 = vmul.f32 %v27_v4, %v19_v6  ;;  %v32_v13 = vmul.f32 %v27_v4, %v20_v7 }
  0x83   :  { %v33_v15 = vmul.f32 %v27_v4, %v21_v8  ;;  %v34_v16 = vmul.f32 %v27_v4, %v22_v9 }
  0x85   :  { %v39_v14 = vpop.permute.xlu0 %38 }
  0x86   :  { %v41_v17 = vadd.f32 %v39_v14, %v29_v10  ;;  %v42_v18 = vadd.f32 %v39_v14, %v30_v11  ;;  %v43_v19 = vadd.f32 %v39_v14, %v31_v12  ;;  %v44_v20 = vadd.f32 %v39_v14, %v32_v13 }
  0x87   :  { %v45_v21 = vadd.f32 %v39_v14, %v33_v15  ;;  %v46_v22 = vadd.f32 %v39_v14, %v34_v16 }
  0x88   :  { %vm47_vm0 = vcmp.gt.f32.partialorder %v41_v17, 0.0  ;;  %vm48_vm1 = vcmp.gt.f32.partialorder %v42_v18, 0.0  ;;  %vm49_vm2 = vcmp.gt.f32.partialorder %v43_v19, 0.0  ;;  %vm50_vm3 = vcmp.gt.f32.partialorder %v44_v20, 0.0 }
  0x89   :  { %vm51_vm4 = vcmp.gt.f32.partialorder %v45_v21, 0.0  ;;  %vm52_vm5 = vcmp.gt.f32.partialorder %v46_v22, 0.0  ;;  %v53_v27 = vmul.f32 0.2, %v41_v17  ;;  %v54_v28 = vmul.f32 0.2, %v42_v18 }
  0x8a   :  { %v55_v29 = vmul.f32 0.2, %v43_v19  ;;  %v56_v30 = vmul.f32 0.2, %v44_v20  ;;  %v57_v31 = vmul.f32 0.2, %v45_v21 }
  0x8b   :  { %v58_v32 = vmul.f32 0.2, %v46_v22  ;;  %v59_v33 = vsel %vm47_vm0, %v41_v17, %v53_v27  ;;  %v60_v34 = vsel %vm48_vm1, %v42_v18, %v54_v28 }
  0x8c   :  { %v61_v37 = vsel %vm49_vm2, %v43_v19, %v55_v29  ;;  %v62_v38 = vsel %vm50_vm3, %v44_v20, %v56_v30  ;;  %v63_v39 = vsel %vm51_vm4, %v45_v21, %v57_v31  ;;  %v71_v40 = vmul.f32 %v65_v23, %v59_v33 }
  0x8d   :  { %v64_v41 = vsel %vm52_vm5, %v46_v22, %v58_v32  ;;  %v72_v42 = vmul.f32 %v66_v24, %v60_v34  ;;  %v73_v43 = vmul.f32 %v67_v25, %v61_v37  ;;  %v74_v44 = vmul.f32 %v68_v26, %v62_v38 }
  0x8e   :  { %v75_v45 = vmul.f32 %v69_v35, %v63_v39  ;;  %v76_v46 = vmul.f32 %v70_v36, %v64_v41  ;;  %77 = vst [vmem:[%s188_s4] sm:$0xff] %v71_v40 }
  0x8f   :  { %78 = vst [vmem:[%s188_s4 + $0x8] sm:$0xff] %v72_v42  ;;  %80 = vst.msk [vmem:[%s188_s4 + $0x10] sm:$0xff] %vm79_vm6, %v73_v43 }
  0x90   :  { %81 = vst [vmem:[%s188_s4 + $0x18] sm:$0xff] %v74_v44  ;;  %82 = vst [vmem:[%s188_s4 + $0x20] sm:$0xff] %v75_v45 }
  0x91   :  { %83 = vst.msk [vmem:[%s188_s4 + $0x28] sm:$0xff] %vm79_vm6, %v76_v46 }

// kernel: sn_gated_proj_conv2d.2
= control target key start
LH: loop header
LB: loop body
LE: loop exit
PB: predicated region body
PF: predicated region fallthrough
CT: control target
= control target key end

     0   :  { %vm62_vm0 = vcmask 130048   ;;  %s4374_s28 = smov 109   ;;  %s4375_s29 = smov 126   ;;  %v4379_v11 = vmov 0.0   ;;  %vm51_vm1 = vcmask 1039360   ;;  %v4383_v53 = vmov 0   ;;  %s5156_s0 = inlined_call_operand.vmem [shape: f32[2,16,324], index: 0, kind: input, shape index: {}]   ;;  %s5157_s1 = inlined_call_operand.vmem [shape: f32[9,16,16], index: 1, kind: input, shape index: {}]   ;;  %s5158_s2 = inlined_call_operand.vmem [shape: f32[16,1], index: 2, kind: input, shape index: {}]   ;;  %s5159_s4 = inlined_call_operand.vmem [shape: f32[2,8,286], index: 4, kind: output, shape index: {0}]   ;;  %s5160_s3 = inlined_call_operand.vmem [shape: f32[1,286], index: 3, kind: input, shape index: {}]   ;;  %s5161_s5 = inlined_call_operand.vmem [shape: f32[2,8,286], index: 5, kind: output, shape index: {1}]   ;;  %s5162_s6 = inlined_call_operand.vmem [shape: f32[1,8,1], index: 6, kind: output, shape index: {2}]   ;;  %s5163_s7 = inlined_call_operand.vmem [shape: f32[1,8,1], index: 7, kind: output, shape index: {3}]  }
   0x1   :  { %v26_v0 = vld [vmem:[%s5156_s0 + $0x10] sm:$0xff]  ;;  %v29_v1 = vld [vmem:[%s5156_s0 + $0x28] sm:$0xff]  ;;  %v4435_v3 = vld [vmem:[%s5156_s0 + $0x20] sm:$0xff]  ;;  %s4376_s13 = smov 108   ;;  %s4377_s14 = smov 110   ;;  %133 = vmatprep.mubr.f32.mxu0 %v4379_v11  ;;  %4349 = vset.pattern.permute.xlu1 %v4383_v53  ;;  %vm394_vm2 = vcmask 1031168  }
   0x2   :  { %v4118_v2 = vpack.i.bf16 %v29_v1, %v26_v0  ;;  %v4440_v4 = vld [vmem:[%s5156_s0 + $0x8] sm:$0xff]  ;;  %v4445_v5 = vld [vmem:[%s5157_s1] sm:$0xff]  ;;  %v4133_v6 = vpack.i.bf16 %v29_v1, %v4435_v3  ;;  %v4461_v9 = vld [vmem:[%s5156_s0 + $0x18] sm:$0xff]  ;;  %s4378_s19 = smov 127   ;;  %v3870_v12 = vpack.c.bf16 %v29_v1, %v26_v0  ;;  %s4380_s20 = smov 92   ;;  %4348 = vset.pattern.permute.xlu0 %v4383_v53  ;;  %vm584_vm3 = vcmask 900096  }
   0x3   :  { %3743 = vmatprep.mubr.msk.f32.mxu1 %vm62_vm0, %v4445_v5  ;;  %v4128_v7 = vpack.i.bf16 %v26_v0, %v4440_v4  ;;  %v4456_v8 = vld [vmem:[%s5156_s0] sm:$0xff]  ;;  %v3866_v13 = vpack.c.bf16 %v4435_v3, %v4440_v4  ;;  %v3598_v15 = vld [vmem:[%s5156_s0 + $0x58] sm:$0xff]  ;;  %v4483_v17 = vld [vmem:[%s5157_s1 + $0x8] sm:$0xff]  ;;  %s4381_s8 = smov 91   ;;  %s4382_s9 = smov 90   ;;  %v4158_v19 = vpack.i.bf16 %v4435_v3, %v4440_v4  ;;  %vm774_vm4 = vcmask 891904  }
   0x4   :  { %4119 = vrot.lane.b32.xlu1 %v4118_v2, %s4374_s28  ;;  %4109 = vrot.lane.b32.xlu0 %v4118_v2, %s4375_s29  ;;  %v4143_v10 = vpack.i.bf16 %v4461_v9, %v4456_v8  ;;  %v3595_v14 = vld [vmem:[%s5156_s0 + $0x40] sm:$0xff]  ;;  %v3868_v16 = vpack.c.bf16 %v4461_v9, %v4456_v8  ;;  %v4509_v21 = vld [vmem:[%s5156_s0 + $0x38] sm:$0xff]  ;;  %vm964_vm5 = vcmask 883712   ;;  %vm1154_vm6 = vcmask 752640  }
   0x5   :  { %3871 = vmatprep.subr.bf16.mxu1 %v3870_v12  ;;  %v4488_v18 = vld [vmem:[%s5157_s1 + $0x20] sm:$0xff]  ;;  %v4163_v20 = vpack.i.bf16 %v3598_v15, %v3595_v14  ;;  %v4213_v22 = vpack.i.bf16 %v3595_v14, %v4509_v21  ;;  %v4517_v23 = vld [vmem:[%s5156_s0 + $0x50] sm:$0xff]  ;;  %v4527_v25 = vld [vmem:[%s5156_s0 + $0x48] sm:$0xff]  ;;  %v4538_v28 = vpack.c.bf16 %v3598_v15, %v3595_v14  ;;  %vm1344_vm7 = vcmask 744448  }
   0x6   :  { %3873 = vmatpush3.bf16.msra.mxu1 %v3870_v12  ;;  %v4522_v24 = vld [vmem:[%s5156_s0 + $0x30] sm:$0xff]  ;;  %v4218_v26 = vpack.i.bf16 %v3598_v15, %v4517_v23  ;;  %v4288_v29 = vpack.i.bf16 %v4517_v23, %v4509_v21  ;;  %v4585_v41 = vld [vmem:[%s5157_s1 + $0x28] sm:$0xff]  ;;  %v3457_v54 = vld [vmem:[%s5158_s2] sm:$0xff]  ;;  %vm1534_vm8 = vcmask 736256   ;;  %vm1729_vm9 = vcmask 244736  }
   0x7   :  { %v4223_v27 = vpack.i.bf16 %v4527_v25, %v4522_v24  ;;  %v4598_v44 = vld [vmem:[%s5157_s1 + $0x30] sm:$0xff]  ;;  %v1710_v62 = vld [vmem:[%s5158_s2 + $0x8] sm:$0xff]  ;;  %v4619_v63 = vld [vmem:[%s5157_s1 + $0x38] sm:$0xff]  ;;  %vm3519_vm10 = vcmask 7168  }
   0x8   :  { %4124 = vrot.lane.b32.xlu1 %v4118_v2, %s4376_s13  ;;  %4114 = vrot.lane.b32.xlu0 %v4118_v2, %s4377_s14  ;;  %v4634_v14 = vld [vmem:[%s5157_s1 + $0x40] sm:$0xff]  ;;  %v4641_v15 = vld [vmem:[%s5157_s1 + $0x10] sm:$0xff] }
   0x9   :  { %3744 = vmatmul.mubr.msk.f32.vlgmr.msra.gmra.mrb[0].mxu1 %vm62_vm0, %v4483_v17 }
   0xa   :  { %3750 = vmatprep.mubr.msk.f32.mxu1 %vm62_vm0, %v4488_v18 }
   0xc   :  { %4134 = vrot.lane.b32.xlu1 %v4133_v6, %s4378_s19  ;;  %4129 = vrot.lane.b32.xlu0 %v4128_v7, %s4378_s19 }
  0x10   :  { %4139 = vrot.lane.b32.xlu0 %v4118_v2, %s4380_s20  ;;  %4144 = vrot.lane.b32.xlu1 %v4143_v10, %s4378_s19 }
  0x14   :  { %4149 = vrot.lane.b32.xlu0 %v4118_v2, %s4381_s8  ;;  %4154 = vrot.lane.b32.xlu1 %v4118_v2, %s4382_s9 }
  0x18   :  { %4159 = vrot.lane.b32.xlu0 %v4158_v19, %s4375_s29  ;;  %4164 = vrot.lane.b32.xlu1 %v4163_v20, %s4378_s19 }
  0x1c   :  { %4169 = vrot.lane.b32.xlu0 %v4143_v10, %s4375_s29  ;;  %4174 = vrot.lane.b32.xlu1 %v4158_v19, %s4377_s14 }
  0x20   :  { %4179 = vrot.lane.b32.xlu0 %v4143_v10, %s4377_s14  ;;  %4184 = vrot.lane.b32.xlu1 %v4158_v19, %s4374_s28 }
  0x24   :  { %4189 = vrot.lane.b32.xlu0 %v4163_v20, %s4375_s29  ;;  %4194 = vrot.lane.b32.xlu1 %v4143_v10, %s4374_s28 }
  0x28   :  { %4199 = vrot.lane.b32.xlu0 %v4158_v19, %s4376_s13  ;;  %4204 = vrot.lane.b32.xlu1 %v4163_v20, %s4377_s14 }
  0x2c   :  { %4209 = vrot.lane.b32.xlu0 %v4143_v10, %s4376_s13  ;;  %4214 = vrot.lane.b32.xlu1 %v4213_v22, %s4374_s28 }
  0x30   :  { %4219 = vrot.lane.b32.xlu0 %v4218_v26, %s4374_s28  ;;  %4224 = vrot.lane.b32.xlu1 %v4223_v27, %s4374_s28 }
  0x34   :  { %4229 = vrot.lane.b32.xlu0 %v4158_v19, %s4380_s20  ;;  %4234 = vrot.lane.b32.xlu1 %v4143_v10, %s4380_s20 }
  0x38   :  { %4239 = vrot.lane.b32.xlu0 %v4213_v22, %s4376_s13  ;;  %4244 = vrot.lane.b32.xlu1 %v4218_v26, %s4376_s13 }
  0x3c   :  { %4249 = vrot.lane.b32.xlu0 %v4158_v19, %s4381_s8  ;;  %4254 = vrot.lane.b32.xlu1 %v4223_v27, %s4376_s13 }
  0x40   :  { %4259 = vrot.lane.b32.xlu0 %v4143_v10, %s4381_s8  ;;  %4264 = vrot.lane.b32.xlu1 %v4158_v19, %s4382_s9 }
  0x44   :  { %4269 = vrot.lane.b32.xlu0 %v4143_v10, %s4382_s9  ;;  %4274 = vrot.lane.b32.xlu1 %v4213_v22, %s4380_s20 }
  0x48   :  { %4279 = vrot.lane.b32.xlu0 %v4218_v26, %s4380_s20  ;;  %4284 = vrot.lane.b32.xlu1 %v4223_v27, %s4380_s20 }
  0x4c   :  { %4289 = vrot.lane.b32.xlu0 %v4288_v29, %s4378_s19  ;;  %4294 = vrot.lane.b32.xlu1 %v4223_v27, %s4378_s19 }
  0x50   :  { %4299 = vrot.lane.b32.xlu0 %v4213_v22, %s4381_s8  ;;  %4304 = vrot.lane.b32.xlu1 %v4218_v26, %s4381_s8 }
  0x54   :  { %4309 = vrot.lane.b32.xlu0 %v4223_v27, %s4381_s8  ;;  %4314 = vrot.lane.b32.xlu1 %v4288_v29, %s4375_s29 }
  0x58   :  { %4319 = vrot.lane.b32.xlu0 %v4223_v27, %s4375_s29  ;;  %4324 = vrot.lane.b32.xlu1 %v4213_v22, %s4382_s9 }
  0x5c   :  { %4329 = vrot.lane.b32.xlu0 %v4218_v26, %s4382_s9  ;;  %4334 = vrot.lane.b32.xlu1 %v4223_v27, %s4382_s9 }
  0x60   :  { %4339 = vrot.lane.b32.xlu0 %v4288_v29, %s4377_s14  ;;  %4344 = vrot.lane.b32.xlu1 %v4223_v27, %s4377_s14 }
  0x64   :  { %3461 = vperm.xlu1 %4349, %v3457_v54   ;;  %1713 = vperm.xlu0 %4348, %v3457_v54  }
  0x68   :  { %1718 = vperm.xlu1 %4349, %v1710_v62   ;;  %3466 = vperm.xlu0 %4348, %v1710_v62  }
  0x76   :  { %v4564_v30 = vpop.permute.xlu1 %4119  ;;  %v4566_v31 = vpop.permute.xlu0 %4109 }
  0x77   :  { %v4112_v32 = vunpack.i.h.bf16 %v4566_v31  ;;  %v4111_v33 = vunpack.i.l.bf16 %v4566_v31  ;;  %v4122_v34 = vunpack.i.h.bf16 %v4564_v30  ;;  %v4121_v35 = vunpack.i.l.bf16 %v4564_v30  ;;  %v4760_v30 = vld [vmem:[%s5157_s1 + $0x70] sm:$0xff] }
  0x79   :  { %v3878_v36 = vpack.c.bf16 %v4112_v32, %v4111_v33  ;;  %v3894_v42 = vpack.c.bf16 %v4122_v34, %v4121_v35 }
  0x7a   :  { %v4576_v37 = vpop.permute.xlu1 %4124  ;;  %v4578_v38 = vpop.permute.xlu0 %4114 }
  0x7b   :  { %v4117_v39 = vunpack.i.h.bf16 %v4578_v38  ;;  %v4116_v40 = vunpack.i.l.bf16 %v4578_v38  ;;  %3879 = vmatprep.subr.bf16.mxu1 %v3878_v36  ;;  %v4127_v55 = vunpack.i.h.bf16 %v4576_v37  ;;  %v4126_v56 = vunpack.i.l.bf16 %v4576_v37  ;;  %v4798_v37 = vld [vmem:[%s5157_s1 + $0x80] sm:$0xff] }
  0x7c   :  { %3881 = vmatpush3.bf16.msra.mxu1 %v3878_v36  ;;  %v4655_v36 = vld [vmem:[%s5157_s1 + $0x18] sm:$0xff] }
  0x7d   :  { %v3886_v43 = vpack.c.bf16 %v4117_v39, %v4116_v40  ;;  %v3902_v6 = vpack.c.bf16 %v4127_v55, %v4126_v56 }
  0x7e   :  { %v4135_v45 = vpop.permute.xlu1 %4134  ;;  %v4130_v46 = vpop.permute.xlu0 %4129 }
  0x7f   :  { %v4137_v47 = vunpack.i.h.bf16 %v4135_v45  ;;  %v4136_v48 = vunpack.i.l.bf16 %v4135_v45  ;;  %v4132_v49 = vunpack.i.h.bf16 %v4130_v46  ;;  %v4131_v50 = vunpack.i.l.bf16 %v4130_v46  ;;  %3751 = vmatmul.mubr.msk.f32.vlgmr.msra.gmra.mrb[0].mxu1 %vm62_vm0, %v4585_v41  ;;  %3887 = vmatprep.subr.bf16.mxu1 %v3886_v43 }
  0x80   :  { %3889 = vmatpush3.bf16.msra.mxu1 %v3886_v43  ;;  %3757 = vmatprep.mubr.msk.f32.mxu1 %vm62_vm0, %v4598_v44 }
  0x81   :  { %v53_v51 = vsel %vm51_vm1, %v4131_v50, %v4132_v49  ;;  %v55_v52 = vsel %vm51_vm1, %v4136_v48, %v4137_v47  ;;  %3895 = vmatprep.subr.bf16.mxu1 %v3894_v42  ;;  %v3862_v0 = vpack.c.bf16 %v4137_v47, %v4132_v49  ;;  %v4672_v47 = vld [vmem:[%s5157_s1 + $0x50] sm:$0xff] }
  0x82   :  { %v4611_v57 = vpop.permute.xlu0 %4139  ;;  %v4145_v58 = vpop.permute.xlu1 %4144  ;;  %v3858_v59 = vpack.c.bf16 %v55_v52, %v53_v51 }
  0x83   :  { %v4147_v60 = vunpack.i.h.bf16 %v4145_v58  ;;  %v4146_v61 = vunpack.i.l.bf16 %v4145_v58  ;;  %v4142_v19 = vunpack.i.h.bf16 %v4611_v57  ;;  %v4141_v20 = vunpack.i.l.bf16 %v4611_v57 }
  0x84   :  { %3859 = vmatprep.subr.bf16.mxu0 %v3858_v59 }
  0x85   :  { %v52_v1 = vsel %vm51_vm1, %v4146_v61, %v4131_v50  ;;  %v54_v2 = vsel %vm51_vm1, %v4147_v60, %v4136_v48  ;;  %v3910_v43 = vpack.c.bf16 %v4142_v19, %v4141_v20 }
  0x86   :  { %v4627_v7 = vpop.permute.xlu0 %4149  ;;  %v4629_v10 = vpop.permute.xlu1 %4154  ;;  %v3860_v12 = vpack.c.bf16 %v54_v2, %v52_v1 }
  0x87   :  { %3758 = vmatmul.mubr.msk.f32.vlgmr.msra.gmra.mrb[0].mxu1 %vm62_vm0, %v4619_v63  ;;  %v4152_v53 = vunpack.i.h.bf16 %v4627_v7  ;;  %v4151_v54 = vunpack.i.l.bf16 %v4627_v7 }
  0x88   :  { %3861 = vmatpush1.bf16.msra.mxu0 %v3860_v12  ;;  %3897 = vmatpush3.bf16.msra.mxu1 %v3894_v42  ;;  %v4660_v42 = vld [vmem:[%s5157_s1 + $0x48] sm:$0xff]  ;;  %v4157_v12 = vunpack.i.h.bf16 %v4629_v10 }
  0x89   :  { %3764 = vmatprep.mubr.msk.f32.mxu1 %vm62_vm0, %v4634_v14  ;;  %3863 = vmatprep.subr.bf16.mxu0 %v3862_v0  ;;  %v3918_v8 = vpack.c.bf16 %v4152_v53, %v4151_v54 }
  0x8a   :  { %v4160_v22 = vpop.permute.xlu0 %4159  ;;  %v4647_v26 = vpop.permute.xlu1 %4164  ;;  %3903 = vmatprep.subr.bf16.mxu1 %v3902_v6 }
  0x8b   :  { %3540 = vmatmul.mubr.msk.f32.vlgmr.msra.gmra.mrb[0].mxu0 %vm62_vm0, %v4641_v15  ;;  %v4162_v27 = vunpack.i.h.bf16 %v4160_v22  ;;  %v4161_v29 = vunpack.i.l.bf16 %v4160_v22  ;;  %v4156_v22 = vunpack.i.l.bf16 %v4629_v10 }
  0x8c   :  { %139 = vmatprep.mubr.f32.mxu0 %v4379_v11  ;;  %3865 = vmatpush3.bf16.msra.mxu0 %v3862_v0 }
  0x8d   :  { %3867 = vmatprep.subr.bf16.mxu0 %v3866_v13  ;;  %v396_v13 = vsel %vm394_vm2, %v4161_v29, %v4111_v33  ;;  %v398_v50 = vsel %vm394_vm2, %v4162_v27, %v4112_v32  ;;  %v4701_v33 = vld [vmem:[%s5157_s1 + $0x58] sm:$0xff] }
  0x8e   :  { %v4170_v45 = vpop.permute.xlu0 %4169  ;;  %v4175_v46 = vpop.permute.xlu1 %4174  ;;  %v3874_v31 = vpack.c.bf16 %v398_v50, %v396_v13 }
  0x8f   :  { %v4172_v48 = vunpack.i.h.bf16 %v4170_v45  ;;  %v4171_v49 = vunpack.i.l.bf16 %v4170_v45  ;;  %3541 = vmatmul.mubr.msk.f32.gmra.mrb[2].mxu0 %vm62_vm0, %v4655_v36  ;;  %3765 = vmatmul.mubr.msk.f32.vlgmr.msra.gmra.mrb[0].mxu1 %vm62_vm0, %v4660_v42  ;;  %v4177_v3 = vunpack.i.h.bf16 %v4175_v46  ;;  %v4176_v4 = vunpack.i.l.bf16 %v4175_v46 }
  0x90   :  { %3736 = vmatprep.mubr.msk.f32.mxu0 %vm62_vm0, %v4641_v15  ;;  %3905 = vmatpush3.bf16.msra.mxu1 %v3902_v6 }
  0x91   :  { %v397_v51 = vsel %vm394_vm2, %v4172_v48, %v4162_v27  ;;  %v395_v52 = vsel %vm394_vm2, %v4171_v49, %v4161_v29  ;;  %3771 = vmatprep.mubr.msk.f32.mxu1 %vm62_vm0, %v4672_v47  ;;  %3911 = vmatprep.subr.bf16.mxu1 %v3910_v43  ;;  %v586_v60 = vsel %vm584_vm3, %v4176_v4, %v4116_v40 }
  0x92   :  { %v4180_v58 = vpop.permute.xlu0 %4179  ;;  %v4185_v59 = vpop.permute.xlu1 %4184  ;;  %v3876_v32 = vpack.c.bf16 %v397_v51, %v395_v52  ;;  %v588_v61 = vsel %vm584_vm3, %v4177_v3, %v4117_v39  ;;  %v4722_v39 = vld [vmem:[%s5157_s1 + $0x60] sm:$0xff] }
  0x93   :  { %3737 = vmatmul.mubr.msk.f32.vlgmr.msra.gmra.mrb[4].mxu0 %vm62_vm0, %v4655_v36  ;;  %v4182_v62 = vunpack.i.h.bf16 %v4180_v58  ;;  %v4181_v0 = vunpack.i.l.bf16 %v4180_v58  ;;  %v3882_v38 = vpack.c.bf16 %v588_v61, %v586_v60  ;;  %v4187_v40 = vunpack.i.h.bf16 %v4185_v59 }
  0x94   :  { %3869 = vmatpush1.bf16.msra.mxu0 %v3868_v16  ;;  %291 = vmatprep.mubr.f32.mxu0 %v4379_v11  ;;  %v4186_v1 = vunpack.i.l.bf16 %v4185_v59  ;;  %v4167_v59 = vunpack.i.h.bf16 %v4647_v26 }
  0x95   :  { %3875 = vmatprep.subr.bf16.mxu0 %v3874_v31  ;;  %v585_v2 = vsel %vm584_vm3, %v4181_v0, %v4176_v4  ;;  %v587_v6 = vsel %vm584_vm3, %v4182_v62, %v4177_v3  ;;  %v778_v48 = vsel %vm774_vm4, %v4187_v40, %v4122_v34  ;;  %v3926_v4 = vpack.c.bf16 %v4157_v12, %v4156_v22  ;;  %v4779_v62 = vld [vmem:[%s5157_s1 + $0x78] sm:$0xff] }
  0x96   :  { %v4713_v9 = vpop.permute.xlu0 %4189  ;;  %v4195_v16 = vpop.permute.xlu1 %4194  ;;  %v3884_v45 = vpack.c.bf16 %v587_v6, %v585_v2  ;;  %v776_v46 = vsel %vm774_vm4, %v4186_v1, %v4121_v35  ;;  %v4166_v31 = vunpack.i.l.bf16 %v4647_v26 }
  0x97   :  { %3544 = vmatmul.mubr.msk.f32.vlgmr.msra.gmra.mrb[0].mxu0 %vm62_vm0, %v4445_v5  ;;  %3772 = vmatmul.mubr.msk.f32.vlgmr.msra.gmra.mrb[0].mxu1 %vm62_vm0, %v4701_v33  ;;  %v4197_v49 = vunpack.i.h.bf16 %v4195_v16  ;;  %v4196_v3 = vunpack.i.l.bf16 %v4195_v16  ;;  %v3890_v35 = vpack.c.bf16 %v778_v48, %v776_v46 }
  0x98   :  { %3877 = vmatpush1.bf16.msra.mxu0 %v3876_v32  ;;  %297 = vmatprep.mubr.f32.mxu0 %v4379_v11 }
  0x99   :  { %3883 = vmatprep.subr.bf16.mxu0 %v3882_v38  ;;  %3913 = vmatpush3.bf16.msra.mxu1 %v3910_v43  ;;  %v4739_v43 = vld [vmem:[%s5157_s1 + $0x68] sm:$0xff]  ;;  %v775_v52 = vsel %vm774_vm4, %v4196_v3, %v4186_v1  ;;  %v777_v58 = vsel %vm774_vm4, %v4197_v49, %v4187_v40  ;;  %v3934_v40 = vpack.c.bf16 %v4167_v59, %v4166_v31 }
  0x9a   :  { %v4200_v27 = vpop.permute.xlu0 %4199  ;;  %v4729_v29 = vpop.permute.xlu1 %4204  ;;  %3778 = vmatprep.mubr.msk.f32.mxu1 %vm62_vm0, %v4722_v39  ;;  %3919 = vmatprep.subr.bf16.mxu1 %v3918_v8  ;;  %v3892_v61 = vpack.c.bf16 %v777_v58, %v775_v52  ;;  %v4815_v3 = vld [vmem:[%s5157_s1 + $0x88] sm:$0xff] }
  0x9b   :  { %3545 = vmatmul.mubr.msk.f32.gmra.mrb[2].mxu0 %vm62_vm0, %v4483_v17  ;;  %v4202_v34 = vunpack.i.h.bf16 %v4200_v27  ;;  %v4201_v51 = vunpack.i.l.bf16 %v4200_v27 }
  0x9c   :  { %475 = vmatprep.mubr.f32.mxu0 %v4379_v11 }
  0x9d   :  { %v966_v0 = vsel %vm964_vm5, %v4201_v51, %v4126_v56 }
  0x9e   :  { %v4210_v13 = vpop.permute.xlu0 %4209  ;;  %v4751_v50 = vpop.permute.xlu1 %4214 }
  0x9f   :  { %3550 = vmatmul.mubr.msk.f32.vlgmr.msra.gmra.mrb[0].mxu0 %vm62_vm0, %v4488_v18  ;;  %3779 = vmatmul.mubr.msk.f32.vlgmr.msra.gmra.mrb[0].mxu1 %vm62_vm0, %v4739_v43  ;;  %v4212_v16 = vunpack.i.h.bf16 %v4210_v13  ;;  %v4211_v38 = vunpack.i.l.bf16 %v4210_v13 }
  0xa0   :  { %3885 = vmatpush1.bf16.msra.mxu0 %v3884_v45  ;;  %481 = vmatprep.mubr.f32.mxu0 %v4379_v11 }
  0xa1   :  { %3891 = vmatprep.subr.bf16.mxu0 %v3890_v35  ;;  %3921 = vmatpush3.bf16.msra.mxu1 %v3918_v8  ;;  %v968_v8 = vsel %vm964_vm5, %v4202_v34, %v4127_v55  ;;  %v965_v27 = vsel %vm964_vm5, %v4211_v38, %v4201_v51  ;;  %v967_v45 = vsel %vm964_vm5, %v4212_v16, %v4202_v34  ;;  %v4192_v35 = vunpack.i.h.bf16 %v4713_v9 }
  0xa2   :  { %v4767_v32 = vpop.permute.xlu0 %4219  ;;  %v4769_v60 = vpop.permute.xlu1 %4224  ;;  %3785 = vmatprep.mubr.msk.f32.mxu1 %vm62_vm0, %v4760_v30  ;;  %3927 = vmatprep.subr.bf16.mxu1 %v3926_v4  ;;  %v3898_v56 = vpack.c.bf16 %v968_v8, %v966_v0  ;;  %v3900_v49 = vpack.c.bf16 %v967_v45, %v965_v27  ;;  %v4191_v34 = vunpack.i.l.bf16 %v4713_v9 }
  0xa3   :  { %3551 = vmatmul.mubr.msk.f32.gmra.mrb[2].mxu0 %vm62_vm0, %v4585_v41 }
  0xa4   :  { %665 = vmatprep.mubr.f32.mxu0 %v4379_v11 }
  0xa6   :  { %v4230_v1 = vpop.permute.xlu0 %4229  ;;  %v4235_v2 = vpop.permute.xlu1 %4234 }
  0xa7   :  { %3556 = vmatmul.mubr.msk.f32.vlgmr.msra.gmra.mrb[0].mxu0 %vm62_vm0, %v4598_v44  ;;  %3786 = vmatmul.mubr.msk.f32.vlgmr.msra.gmra.mrb[0].mxu1 %vm62_vm0, %v4779_v62  ;;  %v4232_v55 = vunpack.i.h.bf16 %v4230_v1  ;;  %v4231_v6 = vunpack.i.l.bf16 %v4230_v1  ;;  %v4237_v51 = vunpack.i.h.bf16 %v4235_v2  ;;  %v4236_v52 = vunpack.i.l.bf16 %v4235_v2 }
  0xa8   :  { %3893 = vmatpush1.bf16.msra.mxu0 %v3892_v61  ;;  %671 = vmatprep.mubr.f32.mxu0 %v4379_v11 }
  0xa9   :  { %3899 = vmatprep.subr.bf16.mxu0 %v3898_v56  ;;  %3929 = vmatpush3.bf16.msra.mxu1 %v3926_v4  ;;  %v1156_v4 = vsel %vm1154_vm6, %v4231_v6, %v4141_v20  ;;  %v1158_v13 = vsel %vm1154_vm6, %v4232_v55, %v4142_v19  ;;  %v3950_v19 = vpack.c.bf16 %v4192_v35, %v4191_v34 }
  0xaa   :  { %v4803_v46 = vpop.permute.xlu0 %4239  ;;  %v4805_v48 = vpop.permute.xlu1 %4244  ;;  %3792 = vmatprep.mubr.msk.f32.mxu1 %vm62_vm0, %v4798_v37  ;;  %3935 = vmatprep.subr.bf16.mxu1 %v3934_v40  ;;  %v3906_v20 = vpack.c.bf16 %v1158_v13, %v1156_v4  ;;  %v1157_v8 = vsel %vm1154_vm6, %v4237_v51, %v4232_v55  ;;  %v1155_v16 = vsel %vm1154_vm6, %v4236_v52, %v4231_v6  ;;  %v5164_v55 = vunpack.i.h.bf16 %v4729_v29 }
  0xab   :  { %3557 = vmatmul.mubr.msk.f32.gmra.mrb[2].mxu0 %vm62_vm0, %v4619_v63  ;;  %v4206_v6 = vunpack.i.l.bf16 %v4729_v29  ;;  %v4217_v52 = vunpack.i.h.bf16 %v4751_v50 }
  0xac   :  { %855 = vmatprep.mubr.f32.mxu0 %v4379_v11 }
  0xae   :  { %v4250_v58 = vpop.permute.xlu0 %4249  ;;  %v4825_v61 = vpop.permute.xlu1 %4254 }
  0xaf   :  { %3562 = vmatmul.mubr.msk.f32.vlgmr.msra.gmra.mrb[0].mxu0 %vm62_vm0, %v4634_v14  ;;  %3793 = vmatmul.mubr.msk.f32.vlgmr.msra.gmra.mrb[0].mxu1 %vm62_vm0, %v4815_v3  ;;  %v4252_v0 = vunpack.i.h.bf16 %v4250_v58  ;;  %v4251_v57 = vunpack.i.l.bf16 %v4250_v58  ;;  %v4216_v58 = vunpack.i.l.bf16 %v4751_v50 }
  0xb0   :  { %3901 = vmatpush1.bf16.msra.mxu0 %v3900_v49  ;;  %3937 = vmatpush3.bf16.msra.mxu1 %v3934_v40  ;;  %v3908_v40 = vpack.c.bf16 %v1157_v8, %v1155_v16  ;;  %v4221_v8 = vunpack.i.l.bf16 %v4767_v32 }
  0xb1   :  { %3907 = vmatprep.subr.bf16.mxu0 %v3906_v20  ;;  %861 = vmatprep.mubr.f32.mxu0 %v4379_v11  ;;  %v1346_v2 = vsel %vm1344_vm7, %v4251_v57, %v4151_v54  ;;  %v1348_v56 = vsel %vm1344_vm7, %v4252_v0, %v4152_v53  ;;  %v4222_v20 = vunpack.i.h.bf16 %v4767_v32 }
  0xb2   :  { %v4260_v38 = vpop.permute.xlu0 %4259  ;;  %v4265_v1 = vpop.permute.xlu1 %4264  ;;  %3799 = vmatprep.mubr.msk.f32.mxu1 %vm62_vm0, %v4641_v15  ;;  %3943 = vmatprep.subr.bf16.mxu1 %v4538_v28  ;;  %v3914_v7 = vpack.c.bf16 %v1348_v56, %v1346_v2 }
  0xb3   :  { %3563 = vmatmul.mubr.msk.f32.gmra.mrb[2].mxu0 %vm62_vm0, %v4660_v42  ;;  %3800 = vmatmul.mubr.msk.f32.vlgmr.msra.gmra.mrb[2].mxu1 %vm62_vm0, %v4655_v36  ;;  %v4262_v27 = vunpack.i.h.bf16 %v4260_v38  ;;  %v4261_v45 = vunpack.i.l.bf16 %v4260_v38  ;;  %v4267_v53 = vunpack.i.h.bf16 %v4265_v1  ;;  %v4266_v54 = vunpack.i.l.bf16 %v4265_v1 }
  0xb4   :  { %1045 = vmatprep.mubr.f32.mxu0 %v4379_v11  ;;  %3945 = vmatpush3.bf16.msra.mxu1 %v4538_v28  ;;  %v3958_v28 = vpack.c.bf16 %v5164_v55, %v4206_v6  ;;  %v2534_v56 = vsel %vm774_vm4, %v4221_v8, %v4222_v20  ;;  %v4226_v55 = vunpack.i.l.bf16 %v4769_v60 }
  0xb5   :  { %3806 = vmatprep.mubr.msk.f32.mxu1 %vm62_vm0, %v4445_v5  ;;  %3951 = vmatprep.subr.bf16.mxu1 %v3950_v19  ;;  %v1345_v13 = vsel %vm1344_vm7, %v4261_v45, %v4251_v57  ;;  %v1347_v51 = vsel %vm1344_vm7, %v4262_v27, %v4252_v0  ;;  %v1536_v57 = vsel %vm1534_vm8, %v4266_v54, %v4156_v22  ;;  %v4227_v45 = vunpack.i.h.bf16 %v4769_v60 }
  0xb6   :  { %v4270_v49 = vpop.permute.xlu0 %4269  ;;  %v4857_v4 = vpop.permute.xlu1 %4274  ;;  %v3916_v0 = vpack.c.bf16 %v1347_v51, %v1345_v13  ;;  %v1538_v32 = vsel %vm1534_vm8, %v4267_v53, %v4157_v12  ;;  %v2531_v26 = vsel %vm774_vm4, %v4226_v55, %v4216_v58 }
  0xb7   :  { %3568 = vmatmul.mubr.msk.f32.vlgmr.msra.gmra.mrb[0].mxu0 %vm62_vm0, %v4672_v47  ;;  %v4272_v1 = vunpack.i.h.bf16 %v4270_v49  ;;  %v3922_v10 = vpack.c.bf16 %v1538_v32, %v1536_v57  ;;  %v2533_v60 = vsel %vm774_vm4, %v4227_v45, %v4221_v8  ;;  %v4241_v32 = vunpack.i.l.bf16 %v4803_v46 }
  0xb8   :  { %3909 = vmatpush1.bf16.msra.mxu0 %v3908_v40  ;;  %1051 = vmatprep.mubr.f32.mxu0 %v4379_v11  ;;  %v4271_v40 = vunpack.i.l.bf16 %v4270_v49 }
  0xb9   :  { %3915 = vmatprep.subr.bf16.mxu0 %v3914_v7  ;;  %v1537_v7 = vsel %vm1534_vm8, %v4272_v1, %v4267_v53  ;;  %v4247_v1 = vunpack.i.h.bf16 %v4805_v48 }
  0xba   :  { %v4872_v16 = vpop.permute.xlu0 %4279  ;;  %v4874_v38 = vpop.permute.xlu1 %4284  ;;  %v1535_v49 = vsel %vm1534_vm8, %v4271_v40, %v4266_v54 }
  0xbb   :  { %3569 = vmatmul.mubr.msk.f32.gmra.mrb[2].mxu0 %vm62_vm0, %v4701_v33  ;;  %3807 = vmatmul.mubr.msk.f32.vlgmr.msra.gmra.mrb[2].mxu1 %vm62_vm0, %v4483_v17 }
  0xbc   :  { %3953 = vmatpush3.bf16.msra.mxu1 %v3950_v19  ;;  %1235 = vmatprep.mubr.f32.mxu0 %v4379_v11  ;;  %v2532_v19 = vsel %vm774_vm4, %v4216_v58, %v4217_v52  ;;  %v3966_v58 = vpack.c.bf16 %v4222_v20, %v4217_v52  ;;  %v4257_v52 = vunpack.i.h.bf16 %v4825_v61  ;;  %v4256_v20 = vunpack.i.l.bf16 %v4825_v61 }
  0xbd   :  { %3813 = vmatprep.mubr.msk.f32.mxu1 %vm62_vm0, %v4488_v18  ;;  %3959 = vmatprep.subr.bf16.mxu1 %v3958_v28  ;;  %v3962_v13 = vpack.c.bf16 %v2534_v56, %v2532_v19  ;;  %v3964_v19 = vpack.c.bf16 %v2533_v60, %v2531_v26  ;;  %v4277_v61 = vunpack.i.h.bf16 %v4857_v4  ;;  %v4282_v60 = vunpack.i.h.bf16 %v4872_v16 }
  0xbe   :  { %v4290_v2 = vpop.permute.xlu0 %4289  ;;  %v4295_v27 = vpop.permute.xlu1 %4294  ;;  %v4281_v26 = vunpack.i.l.bf16 %v4872_v16 }
  0xbf   :  { %3574 = vmatmul.mubr.msk.f32.vlgmr.msra.gmra.mrb[0].mxu0 %vm62_vm0, %v4722_v39  ;;  %v4292_v22 = vunpack.i.h.bf16 %v4290_v2  ;;  %v4291_v12 = vunpack.i.l.bf16 %v4290_v2  ;;  %v4296_v8 = vunpack.i.l.bf16 %v4295_v27 }
  0xc0   :  { %3917 = vmatpush1.bf16.msra.mxu0 %v3916_v0  ;;  %1241 = vmatprep.mubr.f32.mxu0 %v4379_v11  ;;  %v3924_v0 = vpack.c.bf16 %v1537_v7, %v1535_v49 }
  0xc1   :  { %3923 = vmatprep.subr.bf16.mxu0 %v3922_v10  ;;  %v1816_v53 = vsel %vm51_vm1, %v4291_v12, %v4166_v31  ;;  %v1818_v54 = vsel %vm51_vm1, %v4292_v22, %v4167_v59  ;;  %v4246_v31 = vunpack.i.l.bf16 %v4805_v48  ;;  %v4297_v59 = vunpack.i.h.bf16 %v4295_v27 }
  0xc2   :  { %v4899_v51 = vpop.permute.xlu0 %4299  ;;  %v4914_v57 = vpop.permute.xlu1 %4304  ;;  %v3930_v2 = vpack.c.bf16 %v1818_v54, %v1816_v53  ;;  %v1815_v45 = vsel %vm51_vm1, %v4296_v8, %v4291_v12  ;;  %v3938_v53 = vpack.c.bf16 %v4517_v23, %v4509_v21  ;;  %v4276_v54 = vunpack.i.l.bf16 %v4857_v4 }
  0xc3   :  { %3575 = vmatmul.mubr.msk.f32.gmra.mrb[2].mxu0 %vm62_vm0, %v4739_v43  ;;  %3814 = vmatmul.mubr.msk.f32.vlgmr.msra.gmra.mrb[2].mxu1 %vm62_vm0, %v4585_v41  ;;  %v2722_v55 = vsel %vm964_vm5, %v4246_v31, %v4247_v1  ;;  %v1817_v27 = vsel %vm51_vm1, %v4297_v59, %v4292_v22  ;;  %v2719_v59 = vsel %vm964_vm5, %v4256_v20, %v4241_v32  ;;  %v4307_v20 = vunpack.i.h.bf16 %v4914_v57 }
  0xc4   :  { %3961 = vmatpush3.bf16.msra.mxu1 %v3958_v28  ;;  %1425 = vmatprep.mubr.f32.mxu0 %v4379_v11  ;;  %v4242_v28 = vunpack.i.h.bf16 %v4803_v46  ;;  %v3932_v50 = vpack.c.bf16 %v1817_v27, %v1815_v45  ;;  %v2721_v8 = vsel %vm964_vm5, %v4257_v52, %v4246_v31  ;;  %v3940_v21 = vpack.c.bf16 %v4527_v25, %v4522_v24 }
  0xc5   :  { %3963 = vmatprep.subr.bf16.mxu1 %v3962_v13  ;;  %3820 = vmatprep.mubr.msk.f32.mxu1 %vm62_vm0, %v4598_v44  ;;  %v2908_v24 = vsel %vm1154_vm6, %v4276_v54, %v4277_v61  ;;  %v2910_v25 = vsel %vm1154_vm6, %v4281_v26, %v4282_v60  ;;  %v4301_v52 = vunpack.i.l.bf16 %v4899_v51 }
  0xc6   :  { %v4922_v40 = vpop.permute.xlu0 %4309  ;;  %v2720_v10 = vsel %vm964_vm5, %v4241_v32, %v4242_v28  ;;  %v4315_v49 = vpop.permute.xlu1 %4314  ;;  %v3974_v9 = vpack.c.bf16 %v4247_v1, %v4242_v28  ;;  %v3978_v48 = vpack.c.bf16 %v2910_v25, %v2908_v24  ;;  %v4286_v28 = vunpack.i.l.bf16 %v4874_v38 }
  0xc7   :  { %3580 = vmatmul.mubr.msk.f32.vlgmr.msra.gmra.mrb[0].mxu0 %vm62_vm0, %v4760_v30  ;;  %v3970_v7 = vpack.c.bf16 %v2722_v55, %v2720_v10  ;;  %v4317_v13 = vunpack.i.h.bf16 %v4315_v49  ;;  %v3972_v55 = vpack.c.bf16 %v2721_v8, %v2719_v59  ;;  %v4312_v16 = vunpack.i.h.bf16 %v4922_v40 }
  0xc8   :  { %3925 = vmatpush1.bf16.msra.mxu0 %v3924_v0  ;;  %1431 = vmatprep.mubr.f32.mxu0 %v4379_v11  ;;  %v4316_v0 = vunpack.i.l.bf16 %v4315_v49  ;;  %v4302_v49 = vunpack.i.h.bf16 %v4899_v51 }
  0xc9   :  { %3931 = vmatprep.subr.bf16.mxu0 %v3930_v2  ;;  %v2158_v32 = vsel %vm394_vm2, %v4317_v13, %v4192_v35 }
  0xca   :  { %v4320_v56 = vpop.permute.xlu0 %4319  ;;  %v4952_v12 = vpop.permute.xlu1 %4324  ;;  %v2156_v23 = vsel %vm394_vm2, %v4316_v0, %v4191_v34  ;;  %v3990_v59 = vpack.c.bf16 %v4307_v20, %v4302_v49 }
  0xcb   :  { %3581 = vmatmul.mubr.msk.f32.gmra.mrb[2].mxu0 %vm62_vm0, %v4779_v62  ;;  %3821 = vmatmul.mubr.msk.f32.vlgmr.msra.gmra.mrb[2].mxu1 %vm62_vm0, %v4619_v63  ;;  %v4322_v31 = vunpack.i.h.bf16 %v4320_v56  ;;  %v4321_v2 = vunpack.i.l.bf16 %v4320_v56  ;;  %v4287_v56 = vunpack.i.h.bf16 %v4874_v38  ;;  %v5165_v38 = vunpack.i.h.bf16 %v4729_v29 }
  0xcc   :  { %3965 = vmatpush1.bf16.msra.mxu1 %v3964_v19  ;;  %1615 = vmatprep.mubr.f32.mxu0 %v4379_v11 }
  0xcd   :  { %3967 = vmatprep.subr.bf16.mxu1 %v3966_v58  ;;  %2611 = vmatprep.mubr.f32.mxu1 %v4379_v11  ;;  %v2157_v46 = vsel %vm394_vm2, %v4322_v31, %v4317_v13  ;;  %v2909_v45 = vsel %vm1154_vm6, %v4287_v56, %v4281_v26 }
  0xce   :  { %v4946_v22 = vpop.permute.xlu0 %4329  ;;  %v4979_v10 = vpop.permute.xlu1 %4334 }
  0xcf   :  { %3586 = vmatmul.mubr.msk.f32.vlgmr.msra.gmra.mrb[0].mxu0 %vm62_vm0, %v4798_v37  ;;  %3623 = vmatmul.mubr.msk.f32.vlgmr.msra.gmra.mrb[4].mxu1 %vm62_vm0, %v4634_v14  ;;  %v4336_v8 = vunpack.i.l.bf16 %v4979_v10 }
  0xd0   :  { %3969 = vmatpush3.bf16.msra.mxu1 %v3966_v58  ;;  %1621 = vmatprep.mubr.f32.mxu0 %v4379_v11  ;;  %v2155_v58 = vsel %vm394_vm2, %v4321_v2, %v4316_v0 }
  0xd1   :  { %3971 = vmatprep.subr.bf16.mxu1 %v3970_v7  ;;  %2617 = vmatprep.mubr.f32.mxu1 %v4379_v11 }
  0xd2   :  { %3933 = vmatpush1.bf16.msra.mxu0 %v3932_v50  ;;  %v4340_v19 = vpop.permute.xlu0 %4339 }
  0xd3   :  { %3587 = vmatmul.mubr.msk.f32.gmra.mrb[2].mxu0 %vm62_vm0, %v4815_v3  ;;  %3624 = vmatmul.mubr.msk.f32.gmra.mrb[6].mxu1 %vm62_vm0, %v4660_v42  ;;  %v4342_v35 = vunpack.i.h.bf16 %v4340_v19  ;;  %v4341_v34 = vunpack.i.l.bf16 %v4340_v19 }
  0xd4   :  { %1895 = vmatprep.mubr.f32.mxu0 %v4379_v11  ;;  %3939 = vmatprep.subr.bf16.mxu0 %v3938_v53 }
  0xd5   :  { %3827 = vmatprep.mubr.msk.f32.mxu1 %vm62_vm0, %v4634_v14  ;;  %v3946_v14 = vpack.c.bf16 %v2158_v32, %v2156_v23  ;;  %v2344_v1 = vsel %vm584_vm3, %v4341_v34, %v4206_v6  ;;  %v2346_v27 = vsel %vm584_vm3, %v4342_v35, %v5165_v38  ;;  %v4306_v6 = vunpack.i.l.bf16 %v4914_v57 }
  0xd6   :  { %v3954_v29 = vpack.c.bf16 %v2346_v27, %v2344_v1 }
  0xd7   :  { %3601 = vmatmul.mubr.msk.f32.vlgmr.msra.gmra.mrb[6].mxu0 %vm62_vm0, %v4641_v15  ;;  %3828 = vmatmul.mubr.msk.f32.vlgmr.msra.gmra.mrb[2].mxu1 %vm62_vm0, %v4660_v42  ;;  %v4345_v15 = vpop.permute.xlu1 %4344  ;;  %v3948_v42 = vpack.c.bf16 %v2157_v46, %v2155_v58  ;;  %v3098_v57 = vsel %vm1344_vm7, %v4306_v6, %v4307_v20  ;;  %v3097_v26 = vsel %vm1344_vm7, %v4312_v16, %v4306_v6 }
  0xd8   :  { %3941 = vmatpush1.bf16.msra.mxu0 %v3940_v21  ;;  %3973 = vmatpush1.bf16.msra.mxu1 %v3972_v55  ;;  %v4347_v7 = vunpack.i.h.bf16 %v4345_v15  ;;  %v4346_v50 = vunpack.i.l.bf16 %v4345_v15 }
  0xd9   :  { %3947 = vmatprep.subr.bf16.mxu0 %v3946_v14  ;;  %3975 = vmatprep.subr.bf16.mxu1 %v3974_v9 }
  0xda   :  { %1901 = vmatprep.mubr.f32.mxu0 %v4379_v11  ;;  %2799 = vmatprep.mubr.f32.mxu1 %v4379_v11  ;;  %v2345_v51 = vsel %vm584_vm3, %v4347_v7, %v4342_v35  ;;  %v2343_v0 = vsel %vm584_vm3, %v4346_v50, %v4341_v34  ;;  %v21_v34 = vld [vmem:[%s5160_s3] sm:$0x7] }
  0xdb   :  { %3602 = vmatmul.mubr.msk.f32.gmra.mrb[8].mxu0 %vm62_vm0, %v4655_v36  ;;  %3629 = vmatmul.mubr.msk.f32.vlgmr.msra.gmra.mrb[4].mxu1 %vm62_vm0, %v4672_v47  ;;  %v2907_v36 = vsel %vm1154_vm6, %v4286_v28, %v4276_v54  ;;  %v3956_v53 = vpack.c.bf16 %v2345_v51, %v2343_v0  ;;  %v4327_v54 = vunpack.i.h.bf16 %v4952_v12 }
  0xdc   :  { %3977 = vmatpush3.bf16.msra.mxu1 %v3974_v9  ;;  %2053 = vmatprep.mubr.f32.mxu0 %v4379_v11  ;;  %v3980_v13 = vpack.c.bf16 %v2909_v45, %v2907_v36 }
  0xdd   :  { %2805 = vmatprep.mubr.f32.mxu1 %v4379_v11  ;;  %3979 = vmatprep.subr.bf16.mxu1 %v3978_v48 }
  0xdf   :  { %3605 = vmatmul.mubr.msk.f32.vlgmr.msra.gmra.mrb[6].mxu0 %vm62_vm0, %v4445_v5  ;;  %3630 = vmatmul.mubr.msk.f32.gmra.mrb[6].mxu1 %vm62_vm0, %v4701_v33  ;;  %v3982_v5 = vpack.c.bf16 %v4282_v60, %v4277_v61  ;;  %v4311_v61 = vunpack.i.l.bf16 %v4922_v40  ;;  %v4326_v40 = vunpack.i.l.bf16 %v4952_v12 }
  0xe0   :  { %3949 = vmatpush1.bf16.msra.mxu0 %v3948_v42  ;;  %3834 = vmatprep.mubr.msk.f32.mxu1 %vm62_vm0, %v4672_v47  ;;  %v3096_v47 = vsel %vm1344_vm7, %v4301_v52, %v4302_v49 }
  0xe1   :  { %3955 = vmatprep.subr.bf16.mxu0 %v3954_v29  ;;  %2059 = vmatprep.mubr.f32.mxu0 %v4379_v11  ;;  %v3986_v4 = vpack.c.bf16 %v3098_v57, %v3096_v47  ;;  %v3095_v60 = vsel %vm1344_vm7, %v4311_v61, %v4301_v52 }
  0xe3   :  { %3835 = vmatmul.mubr.msk.f32.vlgmr.msra.gmra.mrb[2].mxu1 %vm62_vm0, %v4701_v33  ;;  %3606 = vmatmul.mubr.msk.f32.gmra.mrb[8].mxu0 %vm62_vm0, %v4483_v17  ;;  %v4332_v17 = vunpack.i.h.bf16 %v4946_v22  ;;  %v4331_v33 = vunpack.i.l.bf16 %v4946_v22  ;;  %v3284_v22 = vsel %vm1534_vm8, %v4326_v40, %v4327_v54 }
  0xe4   :  { %3981 = vmatpush1.bf16.msra.mxu1 %v3980_v13  ;;  %2987 = vmatprep.mubr.f32.mxu1 %v4379_v11 }
  0xe5   :  { %3983 = vmatprep.subr.bf16.mxu1 %v3982_v5  ;;  %2235 = vmatprep.mubr.f32.mxu0 %v4379_v11  ;;  %v3286_v12 = vsel %vm1534_vm8, %v4331_v33, %v4332_v17  ;;  %v3998_v23 = vpack.c.bf16 %v4332_v17, %v4327_v54 }
  0xe7   :  { %3635 = vmatmul.mubr.msk.f32.vlgmr.msra.gmra.mrb[4].mxu1 %vm62_vm0, %v4722_v39  ;;  %3611 = vmatmul.mubr.msk.f32.vlgmr.msra.gmra.mrb[6].mxu0 %vm62_vm0, %v4488_v18  ;;  %v3988_v18 = vpack.c.bf16 %v3097_v26, %v3095_v60 }
  0xe8   :  { %3985 = vmatpush3.bf16.msra.mxu1 %v3982_v5  ;;  %2993 = vmatprep.mubr.f32.mxu1 %v4379_v11 }
  0xe9   :  { %2241 = vmatprep.mubr.f32.mxu0 %v4379_v11  ;;  %3957 = vmatpush1.bf16.msra.mxu0 %v3956_v53 }
  0xea   :  { %3987 = vmatprep.subr.bf16.mxu1 %v3986_v4 }
  0xeb   :  { %3636 = vmatmul.mubr.msk.f32.gmra.mrb[6].mxu1 %vm62_vm0, %v4739_v43  ;;  %3612 = vmatmul.mubr.msk.f32.gmra.mrb[8].mxu0 %vm62_vm0, %v4585_v41  ;;  %v3994_v41 = vpack.c.bf16 %v3286_v12, %v3284_v22 }
  0xec   :  { %3841 = vmatprep.mubr.msk.f32.mxu1 %vm62_vm0, %v4722_v39  ;;  %2423 = vmatprep.mubr.f32.mxu0 %v4379_v11  ;;  %v4337_v39 = vunpack.i.h.bf16 %v4979_v10  ;;  %v1714_v10 = vpop.permute.xlu0 %1713 }
  0xef   :  { %3842 = vmatmul.mubr.msk.f32.vlgmr.msra.gmra.mrb[2].mxu1 %vm62_vm0, %v4739_v43  ;;  %3617 = vmatmul.mubr.msk.f32.vlgmr.msra.gmra.mrb[6].mxu0 %vm62_vm0, %v4598_v44  ;;  %v3285_v44 = vsel %vm1534_vm8, %v4337_v39, %v4331_v33  ;;  %v3283_v43 = vsel %vm1534_vm8, %v4336_v8, %v4326_v40 }
  0xf0   :  { %3989 = vmatpush1.bf16.msra.mxu1 %v3988_v18  ;;  %3175 = vmatprep.mubr.f32.mxu1 %v4379_v11  ;;  %v3996_v21 = vpack.c.bf16 %v3285_v44, %v3283_v43 }
  0xf1   :  { %3991 = vmatprep.subr.bf16.mxu1 %v3990_v59  ;;  %2429 = vmatprep.mubr.f32.mxu0 %v4379_v11 }
  0xf3   :  { %3641 = vmatmul.mubr.msk.f32.vlgmr.msra.gmra.mrb[4].mxu1 %vm62_vm0, %v4760_v30  ;;  %3618 = vmatmul.mubr.msk.f32.gmra.mrb[8].mxu0 %vm62_vm0, %v4619_v63 }
  0xf4   :  { %3993 = vmatpush3.bf16.msra.mxu1 %v3990_v59  ;;  %3181 = vmatprep.mubr.f32.mxu1 %v4379_v11 }
  0xf5   :  { %3995 = vmatprep.subr.bf16.mxu1 %v3994_v41 }
  0xf7   :  { %3642 = vmatmul.mubr.msk.f32.gmra.mrb[6].mxu1 %vm62_vm0, %v4779_v62 }
  0xf8   :  { %3848 = vmatprep.mubr.msk.f32.mxu1 %vm62_vm0, %v4760_v30 }
  0xfb   :  { %3849 = vmatmul.mubr.msk.f32.vlgmr.msra.gmra.mrb[2].mxu1 %vm62_vm0, %v4779_v62  ;;  %v5094_v62 = vpop.permute.xlu1 %3461 }
  0xfc   :  { %3997 = vmatpush1.bf16.msra.mxu1 %v3996_v21  ;;  %3363 = vmatprep.mubr.f32.mxu1 %v4379_v11 }
  0xfd   :  { %3999 = vmatprep.subr.bf16.mxu1 %v3998_v23 }
  0xff   :  { %3647 = vmatmul.mubr.msk.f32.vlgmr.msra.gmra.mrb[4].mxu1 %vm62_vm0, %v4798_v37  ;;  %v1719_v31 = vpop.permute.xlu1 %1718 }
 0x100   :  { %4001 = vmatpush3.bf16.msra.mxu1 %v3998_v23  ;;  %3369 = vmatprep.mubr.f32.mxu1 %v4379_v11 }
 0x103   :  { %3648 = vmatmul.mubr.msk.f32.gmra.mrb[6].mxu1 %vm62_vm0, %v4815_v3 }
 0x104   :  { %3855 = vmatprep.mubr.msk.f32.mxu1 %vm62_vm0, %v4798_v37 }
 0x107   :  { %3856 = vmatmul.mubr.msk.f32.vlgmr.msra.gmra.mrb[2].mxu1 %vm62_vm0, %v4815_v3  ;;  %v1753_v3 = vlaneseq }
 0x109   :  { %v1754_v14 = vshrl.u32 %v1753_v3, 7 }
 0x10b   :  { %v1763_v35 = vsub.s32 2, %v1754_v14  ;;  %v1755_v56 = vsub.s32 0, %v1754_v14  ;;  %v1759_v58 = vsub.s32 1, %v1754_v14 }
 0x10d   :  { %v5103_v46 = vrot.slane %v21_v34, %v1763_v35  ;;  %v1756_v28 = vrot.slane %v21_v34, %v1755_v56  ;;  %v1760_v42 = vrot.slane %v21_v34, %v1759_v58 }
 0x166   :  { %v3738_v63 = vpop.f32.mrb[4].mxu0 }
 0x167   :  { %v212_v30 = vpop.f32.mrb[5].mxu0 }
 0x182   :  { %v3794_v32 = vpop.f32.mrb[0].mxu1 }
 0x183   :  { %v4002_v2 = vadd.f32 %v3794_v32, %v3738_v63  ;;  %v1694_v19 = vpop.f32.mrb[1].mxu1 }
 0x184   :  { %v4003_v55 = vadd.f32 %v1694_v19, %v212_v30 }
 0x185   :  { %v1726_v11 = vadd.f32 %v4002_v2, %v1719_v31 }
 0x186   :  { %v1723_v24 = vadd.f32 %v4003_v55, %v1714_v10 }
 0x187   :  { %v3592_v25 = vmul.f32 -1.442695, %v1726_v11 }
 0x188   :  { %1730 = vst.msk [vmem:[%s5159_s4 + $0x10] sm:$0xff] %vm1729_vm9, %v1723_v24  ;;  %v1770_v27 = vmul.f32 %v5103_v46, %v1723_v24 }
 0x189   :  { %4350 = vpow2.f32 %v3592_v25 }
 0x18a   :  { %v1779_v6 = vmul.f32 %v1770_v27, %v1723_v24  ;;  %v1772_v5 = vsel %vm1729_vm9, %v1770_v27, 0.0 }
 0x18c   :  { %v1781_v4 = vsel %vm1729_vm9, %v1779_v6, 0.0 }
 0x193   :  { %v4351_v37 = vpop.eup %4350 }
 0x194   :  { %v1742_v9 = vadd.f32 1.0, %v4351_v37 }
 0x196   :  { %4352 = vrcp.f32 %v1742_v9 }
 0x1a0   :  { %v4353_v48 = vpop.eup %4352 }
 0x1a1   :  { %1751 = vst.msk [vmem:[%s5161_s5 + $0x10] sm:$0xff] %vm1729_vm9, %v4353_v48 }
 0x1a2   :  { %v1617_v15 = vpop.f32.mrb[0].mxu0 }
 0x1a3   :  { %v1721_v1 = vadd.f32 %v1714_v10, %v1617_v15  ;;  %v1619_v38 = vpop.f32.mrb[1].mxu0 }
 0x1a4   :  { %v1722_v45 = vadd.f32 %v1714_v10, %v1619_v38 }
 0x1a5   :  { %1727 = vst [vmem:[%s5159_s4] sm:$0xff] %v1721_v1  ;;  %v1768_v36 = vmul.f32 %v1756_v28, %v1721_v1 }
 0x1a6   :  { %1728 = vst [vmem:[%s5159_s4 + $0x8] sm:$0xff] %v1722_v45  ;;  %v1769_v49 = vmul.f32 %v1760_v42, %v1722_v45  ;;  %v1623_v7 = vpop.f32.mrb[2].mxu0 }
 0x1a7   :  { %v1777_v50 = vmul.f32 %v1768_v36, %v1721_v1  ;;  %v1724_v52 = vadd.f32 %v1719_v31, %v1623_v7  ;;  %v1625_v20 = vpop.f32.mrb[3].mxu0 }
 0x1a8   :  { %v1778_v29 = vmul.f32 %v1769_v49, %v1722_v45  ;;  %v1725_v13 = vadd.f32 %v1719_v31, %v1625_v20  ;;  %v1771_v51 = vadd.f32 %v1769_v49, %v1768_v36  ;;  %v3467_v31 = vpop.permute.xlu0 %3466 }
 0x1a9   :  { %v3590_v0 = vmul.f32 -1.442695, %v1724_v52 }
 0x1aa   :  { %v3591_v47 = vmul.f32 -1.442695, %v1725_v13  ;;  %v1773_v57 = vadd.f32 %v1772_v5, %v1771_v51  ;;  %v1780_v53 = vadd.f32 %v1778_v29, %v1777_v50 }
 0x1ab   :  { %4354 = vpow2.f32 %v3590_v0 }
 0x1ac   :  { %4356 = vpow2.f32 %v3591_v47  ;;  %1774 = vadd.xlane.f32.xlu1 %v1773_v57  ;;  %v1782_v16 = vadd.f32 %v1781_v4, %v1780_v53 }
 0x1ae   :  { %1783 = vadd.xlane.f32.xlu0 %v1782_v16 }
 0x1b5   :  { %v4355_v61 = vpop.eup %4354 }
 0x1b6   :  { %v4357_v17 = vpop.eup %4356  ;;  %v1740_v33 = vadd.f32 1.0, %v4355_v61 }
 0x1b7   :  { %v1741_v54 = vadd.f32 1.0, %v4357_v17 }
 0x1b8   :  { %4358 = vrcp.f32 %v1740_v33 }
 0x1b9   :  { %4360 = vrcp.f32 %v1741_v54 }
 0x1c2   :  { %v4359_v40 = vpop.eup %4358  ;;  %v2425_v60 = vpop.f32.mrb[6].mxu0 }
 0x1c3   :  { %v4361_v26 = vpop.eup %4360  ;;  %1749 = vst [vmem:[%s5161_s5] sm:$0xff] %v4359_v40  ;;  %v2427_v18 = vpop.f32.mrb[7].mxu0 }
 0x1c4   :  { %1750 = vst [vmem:[%s5161_s5 + $0x8] sm:$0xff] %v4361_v26 }
 0x1c6   :  { %v2431_v22 = vpop.f32.mrb[8].mxu0 }
 0x1c7   :  { %v2433_v12 = vpop.f32.mrb[9].mxu0 }
 0x1d2   :  { %v3365_v59 = vpop.f32.mrb[4].mxu1 }
 0x1d3   :  { %v4004_v41 = vadd.f32 %v3365_v59, %v2425_v60  ;;  %v3367_v39 = vpop.f32.mrb[5].mxu1 }
 0x1d4   :  { %v4005_v8 = vadd.f32 %v3367_v39, %v2427_v18 }
 0x1d5   :  { %v3469_v44 = vadd.f32 %v4004_v41, %v5094_v62 }
 0x1d6   :  { %v3470_v43 = vadd.f32 %v4005_v8, %v5094_v62  ;;  %v3371_v21 = vpop.f32.mrb[6].mxu1 }
 0x1d7   :  { %3651 = vst [vmem:[%s5159_s4 + $0x18] sm:$0xff] %v3469_v44  ;;  %v4006_v23 = vadd.f32 %v3371_v21, %v2431_v22  ;;  %v3373_v63 = vpop.f32.mrb[7].mxu1  ;;  %v3501_v30 = vmul.f32 %v3469_v44, %v1756_v28 }
 0x1d8   :  { %3652 = vst [vmem:[%s5159_s4 + $0x20] sm:$0xff] %v3470_v43  ;;  %v4007_v32 = vadd.f32 %v3373_v63, %v2433_v12  ;;  %v3502_v2 = vmul.f32 %v3470_v43, %v1760_v42 }
 0x1d9   :  { %v3472_v19 = vadd.f32 %v4006_v23, %v3467_v31  ;;  %v3510_v10 = vmul.f32 %v3501_v30, %v3469_v44 }
 0x1da   :  { %v3473_v55 = vadd.f32 %v4007_v32, %v3467_v31  ;;  %v3857_v11 = vpop.f32.mrb[2].mxu1  ;;  %v3504_v24 = vadd.f32 %v3502_v2, %v3501_v30  ;;  %v3511_v25 = vmul.f32 %v3502_v2, %v3470_v43 }
 0x1db   :  { %v3654_v37 = vmul.f32 -1.442695, %v3472_v19  ;;  %v3474_v3 = vadd.f32 %v3857_v11, %v3467_v31  ;;  %v3442_v9 = vpop.f32.mrb[3].mxu1 }
 0x1dc   :  { %v3655_v14 = vmul.f32 -1.442695, %v3473_v55  ;;  %v3471_v35 = vadd.f32 %v5094_v62, %v3442_v9  ;;  %v3513_v34 = vadd.f32 %v3511_v25, %v3510_v10 }
 0x1dd   :  { %4362 = vpow2.f32 %v3654_v37  ;;  %v3656_v56 = vmul.f32 -1.442695, %v3474_v3 }
 0x1de   :  { %4364 = vpow2.f32 %v3655_v14  ;;  %3653 = vst.msk [vmem:[%s5159_s4 + $0x28] sm:$0xff] %vm1729_vm9, %v3471_v35  ;;  %v3503_v58 = vmul.f32 %v3471_v35, %v5103_v46 }
 0x1df   :  { %4366 = vpow2.f32 %v3656_v56 }
 0x1e0   :  { %v3505_v48 = vsel %vm1729_vm9, %v3503_v58, 0.0  ;;  %v3512_v28 = vmul.f32 %v3503_v58, %v3471_v35 }
 0x1e1   :  { %v3506_v15 = vadd.f32 %v3505_v48, %v3504_v24 }
 0x1e2   :  { %v3514_v42 = vsel %vm1729_vm9, %v3512_v28, 0.0 }
 0x1e3   :  { %3507 = vadd.xlane.f32.xlu0 %v3506_v15  ;;  %v3515_v62 = vadd.f32 %v3514_v42, %v3513_v34 }
 0x1e5   :  { %3516 = vadd.xlane.f32.xlu1 %v3515_v62 }
 0x1e7   :  { %v4363_v1 = vpop.eup %4362 }
 0x1e8   :  { %v4365_v38 = vpop.eup %4364  ;;  %v3488_v27 = vadd.f32 1.0, %v4363_v1 }
 0x1e9   :  { %v4367_v45 = vpop.eup %4366  ;;  %v3489_v36 = vadd.f32 1.0, %v4365_v38 }
 0x1ea   :  { %4368 = vrcp.f32 %v3488_v27  ;;  %v3490_v49 = vadd.f32 1.0, %v4367_v45 }
 0x1eb   :  { %4370 = vrcp.f32 %v3489_v36 }
 0x1ec   :  { %4372 = vrcp.f32 %v3490_v49 }
 0x1f4   :  { %v4369_v46 = vpop.eup %4368 }
 0x1f5   :  { %v4371_v7 = vpop.eup %4370  ;;  %3657 = vst [vmem:[%s5161_s5 + $0x18] sm:$0xff] %v4369_v46 }
 0x1f6   :  { %v4373_v50 = vpop.eup %4372  ;;  %3658 = vst [vmem:[%s5161_s5 + $0x20] sm:$0xff] %v4371_v7 }
 0x1f7   :  { %3659 = vst.msk [vmem:[%s5161_s5 + $0x28] sm:$0xff] %vm1729_vm9, %v4373_v50 }
 0x239   :  { %v1775_v20 = vpop.xlane.xlu1 %1774 }
 0x23b   :  { %v1784_v52 = vpop.xlane.xlu0 %1783 }
 0x270   :  { %v3508_v6 = vpop.xlane.xlu0 %3507 }
 0x271   :  { %v3509_v29 = vadd.f32 %v3508_v6, %v1775_v20 }
 0x272   :  { %v3517_v13 = vpop.xlane.xlu1 %3516 }
 0x273   :  { %3520 = vst.msk [vmem:[%s5162_s6] sm:$0xff] %vm3519_vm10, %v3509_v29  ;;  %v3518_v51 = vadd.f32 %v3517_v13, %v1784_v52 }
 0x275   :  { %3521 = vst.msk [vmem:[%s5163_s7] sm:$0xff] %vm3519_vm10, %v3518_v51 }

</bundles_post_ra>
